<compile_context>
chip_gen: v7x
topology: tpu7x:2x2x1
jax: 0.10.0
libtpu: 0.0.40
codegen_flags: <defaults>
</compile_context>

<pallas_src>
import jax
import jax.numpy as jnp
from jax.experimental import pallas as pl
from jax.experimental.pallas import tpu as pltpu


def attention_kernel(z_ref, w1_ref, b1_ref, w2_ref, out_ref, beta_ref):
    # z_ref   : (M, TN, D)   one dense (TN, D) slab per view
    # w1_ref  : (D, H)   b1_ref : (1, H)   w2_ref : (1, H)
    # out_ref : (TN, D)  beta_ref : (TN, M)
    m_views, tn, _ = z_ref.shape
    h_dim = w1_ref.shape[1]

    w1 = w1_ref[...]                                        # (D, H)
    # Hoist broadcasts out of the unrolled view loop (JAX does not CSE them).
    b1b = jnp.broadcast_to(b1_ref[...], (tn, h_dim))        # (TN, H)
    w2b = jnp.broadcast_to(w2_ref[...], (tn, h_dim))        # (TN, H)

    z_views = []
    scores = []
    for m in range(m_views):                                # unrolled, M is static
        zm = z_ref[m]                                       # (TN, D) dense 2-D load
        z_views.append(zm)
        hm = jnp.tanh(
            jnp.dot(zm, w1, preferred_element_type=jnp.float32) + b1b
        )                                                   # (TN, H)  MXU + VPU/EUP
        # width-1 Linear as VPU multiply + lane reduce (keeps MXU result path free)
        sm = jnp.sum(hm * w2b, axis=-1, keepdims=True)      # (TN, 1)
        scores.append(sm)

    # Softmax over the view axis, unrolled into elementwise ops.
    s_max = scores[0]
    for sm in scores[1:]:
        s_max = jnp.maximum(s_max, sm)
    exps = [jnp.exp(sm - s_max) for sm in scores]           # (TN, 1) each
    denom = exps[0]
    for em in exps[1:]:
        denom = denom + em
    inv = pl.reciprocal(denom, approx=False)                # (TN, 1)
    betas = [em * inv for em in exps]                       # (TN, 1) each

    # Weighted sum over views: pure elementwise multiply-add on (TN, D).
    fused = betas[0] * z_views[0]
    for bm, zm in zip(betas[1:], z_views[1:]):
        fused = fused + bm * zm
    out_ref[...] = fused.astype(out_ref.dtype)

    # Assemble beta as a dense (TN, M) block with iota/select (no lane concat,
    # no (.., M, 1) padded layout); single full-block store.
    lane_ids = jax.lax.broadcasted_iota(jnp.int32, (tn, m_views), 1)
    beta_block = jnp.zeros((tn, m_views), jnp.float32)
    for m in range(m_views):
        beta_block = jnp.where(lane_ids == m, betas[m], beta_block)
    beta_ref[...] = beta_block.astype(beta_ref.dtype)


def attention_forward(z, w1, b1, w2, *, tile_n=128):
    """z: (N, M, D) f32; w1: (D, H); b1: (H,); w2: (H, 1).

    Returns (fused (N, D), beta (N, M, 1)) -- same as the torch Attention module.
    """
    N, M, D = z.shape
    H = w1.shape[1]

    # Pad N up to a multiple of tile_n (padded rows are discarded afterwards).
    n_pad = (-N) % tile_n
    z_p = jnp.pad(z, ((0, n_pad), (0, 0), (0, 0))) if n_pad else z
    Np = N + n_pad

    # Major-axis transpose only (D stays minor => contiguous-row copy); the kernel
    # then sees dense per-view (tile_n, D) slabs.
    z_t = jnp.transpose(z_p, (1, 0, 2))                      # (M, Np, D)
    b1_2d = b1.reshape(1, H)
    w2_row = w2.reshape(1, H)

    grid = (Np // tile_n,)
    out_shapes = (
        jax.ShapeDtypeStruct((Np, D), jnp.float32),          # fused
        jax.ShapeDtypeStruct((Np, M), jnp.float32),          # beta (dense 2-D)
    )

    fused, beta_nm = pl.pallas_call(
        attention_kernel,
        out_shape=out_shapes,
        grid_spec=pltpu.PrefetchScalarGridSpec(
            num_scalar_prefetch=0,
            grid=grid,
            in_specs=[
                pl.BlockSpec((M, tile_n, D), lambda i: (0, i, 0)),   # z views
                pl.BlockSpec((D, H), lambda i: (0, 0)),              # W1 (whole)
                pl.BlockSpec((1, H), lambda i: (0, 0)),              # b1 (whole)
                pl.BlockSpec((1, H), lambda i: (0, 0)),              # w2 row (whole)
            ],
            out_specs=[
                pl.BlockSpec((tile_n, D), lambda i: (i, 0)),
                pl.BlockSpec((tile_n, M), lambda i: (i, 0)),
            ],
        ),
        compiler_params=pltpu.CompilerParams(
            dimension_semantics=("parallel",),
        ),
    )(z_t, w1, b1_2d, w2_row)

    fused = fused[:N]
    beta = beta_nm[:N, :, None]                              # (N, M, 1) like torch
    return fused, beta


def attention_reference(z, w1, b1, w2):
    # Pure-JAX reference mirroring the torch module.
    w = jnp.einsum("nmd,dh->nmh", z, w1) + b1      # Linear
    w = jnp.tanh(w)
    w = jnp.einsum("nmh,ho->nmo", w, w2)           # Linear(hidden, 1, bias=False)
    beta = jax.nn.softmax(w, axis=1)
    out = (beta * z).sum(axis=1)
    return out, beta


if __name__ == "__main__":
    # Spatial_MGCN attention: M = 3 views (SGCN / (CGCN_s + CGCN_f)/2 / FGCN),
    # in_size D = nhid2 = 32, hidden = 16.  N = 256 nodes.
    N, M, D, H = 256, 3, 32, 16
    key = jax.random.PRNGKey(0)
    k_z, k_w1, k_b1, k_w2 = jax.random.split(key, 4)

    z = jax.random.normal(k_z, (N, M, D), dtype=jnp.float32)
    # Deterministic "Linear"-style init (uniform in +/- 1/sqrt(fan_in)).
    w1 = jax.random.uniform(k_w1, (D, H), minval=-1.0 / D**0.5,
                            maxval=1.0 / D**0.5, dtype=jnp.float32)
    b1 = jax.random.uniform(k_b1, (H,), minval=-1.0 / D**0.5,
                            maxval=1.0 / D**0.5, dtype=jnp.float32)
    w2 = jax.random.uniform(k_w2, (H, 1), minval=-1.0 / H**0.5,
                            maxval=1.0 / H**0.5, dtype=jnp.float32)

    out, beta = attention_forward(z, w1, b1, w2, tile_n=128)
    out = jax.block_until_ready(out)
    beta = jax.block_until_ready(beta)

    out_ref, beta_ref = attention_reference(z, w1, b1, w2)
    assert out.shape == (N, D) and beta.shape == (N, M, 1)
    assert jnp.allclose(out, out_ref, atol=1e-5, rtol=1e-5)
    assert jnp.allclose(beta, beta_ref, atol=1e-5, rtol=1e-5)

    # Exercise the general-N (padded) path with a non-divisible N.
    N2 = 100
    z2 = jax.random.normal(jax.random.PRNGKey(1), (N2, M, D), dtype=jnp.float32)
    out2, beta2 = attention_forward(z2, w1, b1, w2, tile_n=64)
    out2 = jax.block_until_ready(out2)
    beta2 = jax.block_until_ready(beta2)
    out2_ref, beta2_ref = attention_reference(z2, w1, b1, w2)
    assert out2.shape == (N2, D) and beta2.shape == (N2, M, 1)
    assert jnp.allclose(out2, out2_ref, atol=1e-5, rtol=1e-5)
    assert jnp.allclose(beta2, beta2_ref, atol=1e-5, rtol=1e-5)

    print("KERNEL_OK")
</pallas_src>

<mosaic_0001>
module attributes {stable_mosaic.version = 11 : i64} {
  func.func @attention_kernel(%arg0: i32, %arg1: memref<3x128x32xf32, #tpu.memory_space<vmem>>, %arg2: memref<32x16xf32, #tpu.memory_space<vmem>>, %arg3: memref<1x16xf32, #tpu.memory_space<vmem>>, %arg4: memref<1x16xf32, #tpu.memory_space<vmem>>, %arg5: memref<128x32xf32, #tpu.memory_space<vmem>>, %arg6: memref<128x3xf32, #tpu.memory_space<vmem>>) attributes {dimension_semantics = [#tpu.dimension_semantics<parallel>], iteration_bounds = array<i64: 2>, scalar_prefetch = 0 : i64, scratch_operands = 0 : i64, tpu.core_type = #tpu.core_type<tc>, window_params = [{transform_indices = @transform_0, window_bounds = array<i64: 3, 128, 32>}, {pipeline_mode = #tpu.pipeline_mode<synchronous>, transform_indices = @transform_1, window_bounds = array<i64: 32, 16>}, {pipeline_mode = #tpu.pipeline_mode<synchronous>, transform_indices = @transform_2, window_bounds = array<i64: 1, 16>}, {pipeline_mode = #tpu.pipeline_mode<synchronous>, transform_indices = @transform_3, window_bounds = array<i64: 1, 16>}, {transform_indices = @transform_4, window_bounds = array<i64: 128, 32>}, {transform_indices = @transform_5, window_bounds = array<i64: 128, 3>}]} {
    %c0 = arith.constant 0 : index
    %c0_0 = arith.constant 0 : index
    %0 = vector.load %arg2[%c0, %c0_0] : memref<32x16xf32, #tpu.memory_space<vmem>>, vector<32x16xf32>
    %c0_1 = arith.constant 0 : index
    %c0_2 = arith.constant 0 : index
    %1 = vector.load %arg3[%c0_1, %c0_2] : memref<1x16xf32, #tpu.memory_space<vmem>>, vector<1x16xf32>
    %2 = vector.shape_cast %1 : vector<1x16xf32> to vector<1x16xf32>
    %3 = vector.broadcast %2 : vector<1x16xf32> to vector<128x16xf32>
    %c0_3 = arith.constant 0 : index
    %c0_4 = arith.constant 0 : index
    %4 = vector.load %arg4[%c0_3, %c0_4] : memref<1x16xf32, #tpu.memory_space<vmem>>, vector<1x16xf32>
    %5 = vector.shape_cast %4 : vector<1x16xf32> to vector<1x16xf32>
    %6 = vector.broadcast %5 : vector<1x16xf32> to vector<128x16xf32>
    %c0_5 = arith.constant 0 : index
    %c0_6 = arith.constant 0 : index
    %c0_7 = arith.constant 0 : index
    %7 = vector.load %arg1[%c0_5, %c0_6, %c0_7] : memref<3x128x32xf32, #tpu.memory_space<vmem>>, vector<1x128x32xf32>
    %8 = vector.shape_cast %7 : vector<1x128x32xf32> to vector<128x32xf32>
    %cst = arith.constant dense<0.000000e+00> : vector<128x16xf32>
    %9 = tpu.matmul %8, %0, %cst {dimension_numbers = #tpu.dot_dimension_numbers<[1], [0], [0], [1], [0, 0, 1, 1], [], []>} : vector<128x32xf32>, vector<32x16xf32>, vector<128x16xf32> -> vector<128x16xf32>
    %10 = arith.addf %9, %3 : vector<128x16xf32>
    %11 = math.tanh %10 : vector<128x16xf32>
    %12 = arith.mulf %11, %6 : vector<128x16xf32>
    %cst_8 = arith.constant dense<0.000000e+00> : vector<128xf32>
    %13 = vector.multi_reduction <add>, %12, %cst_8 [1] : vector<128x16xf32> to vector<128xf32>
    %14 = vector.shape_cast %13 : vector<128xf32> to vector<128x1xf32>
    %c1 = arith.constant 1 : index
    %c0_9 = arith.constant 0 : index
    %c0_10 = arith.constant 0 : index
    %15 = vector.load %arg1[%c1, %c0_9, %c0_10] : memref<3x128x32xf32, #tpu.memory_space<vmem>>, vector<1x128x32xf32>
    %16 = vector.shape_cast %15 : vector<1x128x32xf32> to vector<128x32xf32>
    %cst_11 = arith.constant dense<0.000000e+00> : vector<128x16xf32>
    %17 = tpu.matmul %16, %0, %cst_11 {dimension_numbers = #tpu.dot_dimension_numbers<[1], [0], [0], [1], [0, 0, 1, 1], [], []>} : vector<128x32xf32>, vector<32x16xf32>, vector<128x16xf32> -> vector<128x16xf32>
    %18 = arith.addf %17, %3 : vector<128x16xf32>
    %19 = math.tanh %18 : vector<128x16xf32>
    %20 = arith.mulf %19, %6 : vector<128x16xf32>
    %cst_12 = arith.constant dense<0.000000e+00> : vector<128xf32>
    %21 = vector.multi_reduction <add>, %20, %cst_12 [1] : vector<128x16xf32> to vector<128xf32>
    %22 = vector.shape_cast %21 : vector<128xf32> to vector<128x1xf32>
    %c2 = arith.constant 2 : index
    %c0_13 = arith.constant 0 : index
    %c0_14 = arith.constant 0 : index
    %23 = vector.load %arg1[%c2, %c0_13, %c0_14] : memref<3x128x32xf32, #tpu.memory_space<vmem>>, vector<1x128x32xf32>
    %24 = vector.shape_cast %23 : vector<1x128x32xf32> to vector<128x32xf32>
    %cst_15 = arith.constant dense<0.000000e+00> : vector<128x16xf32>
    %25 = tpu.matmul %24, %0, %cst_15 {dimension_numbers = #tpu.dot_dimension_numbers<[1], [0], [0], [1], [0, 0, 1, 1], [], []>} : vector<128x32xf32>, vector<32x16xf32>, vector<128x16xf32> -> vector<128x16xf32>
    %26 = arith.addf %25, %3 : vector<128x16xf32>
    %27 = math.tanh %26 : vector<128x16xf32>
    %28 = arith.mulf %27, %6 : vector<128x16xf32>
    %cst_16 = arith.constant dense<0.000000e+00> : vector<128xf32>
    %29 = vector.multi_reduction <add>, %28, %cst_16 [1] : vector<128x16xf32> to vector<128xf32>
    %30 = vector.shape_cast %29 : vector<128xf32> to vector<128x1xf32>
    %31 = arith.maximumf %14, %22 : vector<128x1xf32>
    %32 = arith.maximumf %31, %30 : vector<128x1xf32>
    %33 = arith.subf %14, %32 : vector<128x1xf32>
    %34 = math.exp %33 : vector<128x1xf32>
    %35 = arith.subf %22, %32 : vector<128x1xf32>
    %36 = math.exp %35 : vector<128x1xf32>
    %37 = arith.subf %30, %32 : vector<128x1xf32>
    %38 = math.exp %37 : vector<128x1xf32>
    %39 = arith.addf %34, %36 : vector<128x1xf32>
    %40 = arith.addf %39, %38 : vector<128x1xf32>
    %41 = tpu.reciprocal %40 : vector<128x1xf32> -> vector<128x1xf32>
    %42 = arith.mulf %34, %41 : vector<128x1xf32>
    %43 = arith.mulf %36, %41 : vector<128x1xf32>
    %44 = arith.mulf %38, %41 : vector<128x1xf32>
    %45 = vector.broadcast %42 : vector<128x1xf32> to vector<128x32xf32>
    %46 = arith.mulf %45, %8 : vector<128x32xf32>
    %47 = vector.broadcast %43 : vector<128x1xf32> to vector<128x32xf32>
    %48 = arith.mulf %47, %16 : vector<128x32xf32>
    %49 = arith.addf %46, %48 : vector<128x32xf32>
    %50 = vector.broadcast %44 : vector<128x1xf32> to vector<128x32xf32>
    %51 = arith.mulf %50, %24 : vector<128x32xf32>
    %52 = arith.addf %49, %51 : vector<128x32xf32>
    %c0_17 = arith.constant 0 : index
    %c0_18 = arith.constant 0 : index
    %53 = vector.load %arg5[%c0_17, %c0_18] : memref<128x32xf32, #tpu.memory_space<vmem>>, vector<128x32xf32>
    tpu.vector_store %arg5[%c0_17, %c0_18], %52 {strides = array<i32>} : memref<128x32xf32, #tpu.memory_space<vmem>>, vector<128x32xf32>,
    %54 = tpu.iota {dimensions = array<i32: 1>} : vector<128x3xi32>
    %cst_19 = arith.constant 0.000000e+00 : f32
    %55 = vector.broadcast %cst_19 : f32 to vector<128x3xf32>
    %c0_i32 = arith.constant 0 : i32
    %56 = vector.broadcast %c0_i32 : i32 to vector<128x3xi32>
    %57 = arith.cmpi eq, %54, %56 : vector<128x3xi32>
    %58 = vector.shape_cast %42 : vector<128x1xf32> to vector<128x1xf32>
    %59 = vector.broadcast %58 : vector<128x1xf32> to vector<128x3xf32>
    %60 = arith.select %57, %59, %55 : vector<128x3xi1>, vector<128x3xf32>
    %c1_i32 = arith.constant 1 : i32
    %61 = vector.broadcast %c1_i32 : i32 to vector<128x3xi32>
    %62 = arith.cmpi eq, %54, %61 : vector<128x3xi32>
    %63 = vector.shape_cast %43 : vector<128x1xf32> to vector<128x1xf32>
    %64 = vector.broadcast %63 : vector<128x1xf32> to vector<128x3xf32>
    %65 = arith.select %62, %64, %60 : vector<128x3xi1>, vector<128x3xf32>
    %c2_i32 = arith.constant 2 : i32
    %66 = vector.broadcast %c2_i32 : i32 to vector<128x3xi32>
    %67 = arith.cmpi eq, %54, %66 : vector<128x3xi32>
    %68 = vector.shape_cast %44 : vector<128x1xf32> to vector<128x1xf32>
    %69 = vector.broadcast %68 : vector<128x1xf32> to vector<128x3xf32>
    %70 = arith.select %67, %69, %65 : vector<128x3xi1>, vector<128x3xf32>
    %c0_20 = arith.constant 0 : index
    %c0_21 = arith.constant 0 : index
    %71 = vector.load %arg6[%c0_20, %c0_21] : memref<128x3xf32, #tpu.memory_space<vmem>>, vector<128x3xf32>
    tpu.vector_store %arg6[%c0_20, %c0_21], %70 {strides = array<i32>} : memref<128x3xf32, #tpu.memory_space<vmem>>, vector<128x3xf32>,
    return
  }
  func.func @transform_0(%arg0: i32) -> (i32, i32, i32) {
    %c0_i32 = arith.constant 0 : i32
    %c0_i32_0 = arith.constant 0 : i32
    %c0_i32_1 = arith.constant 0 : i32
    return %c0_i32, %arg0, %c0_i32_0 : i32, i32, i32
  }
  func.func @transform_1(%arg0: i32) -> (i32, i32) {
    %c0_i32 = arith.constant 0 : i32
    %c0_i32_0 = arith.constant 0 : i32
    %c0_i32_1 = arith.constant 0 : i32
    return %c0_i32, %c0_i32_0 : i32, i32
  }
  func.func @transform_2(%arg0: i32) -> (i32, i32) {
    %c0_i32 = arith.constant 0 : i32
    %c0_i32_0 = arith.constant 0 : i32
    %c0_i32_1 = arith.constant 0 : i32
    return %c0_i32, %c0_i32_0 : i32, i32
  }
  func.func @transform_3(%arg0: i32) -> (i32, i32) {
    %c0_i32 = arith.constant 0 : i32
    %c0_i32_0 = arith.constant 0 : i32
    %c0_i32_1 = arith.constant 0 : i32
    return %c0_i32, %c0_i32_0 : i32, i32
  }
  func.func @transform_4(%arg0: i32) -> (i32, i32) {
    %c0_i32 = arith.constant 0 : i32
    %c0_i32_0 = arith.constant 0 : i32
    return %arg0, %c0_i32 : i32, i32
  }
  func.func @transform_5(%arg0: i32) -> (i32, i32) {
    %c0_i32 = arith.constant 0 : i32
    %c0_i32_0 = arith.constant 0 : i32
    return %arg0, %c0_i32 : i32, i32
  }
}

</mosaic_0001>

<bundles_post_ra>
// kernel: tpu_custom_call.1
= control target key start
LH: loop header
LB: loop body
LE: loop exit
PB: predicated region body
PF: predicated region fallthrough
CT: control target
= control target key end

     0   :  { %s2519_s18 = smov 0   ;;  %s2521_s19 = smov 0   ;;  %s3544_s0 = inlined_call_operand.vmem [shape: f32[3,256,32], index: 0, kind: input, shape index: {}]   ;;  %s3545_s1 = inlined_call_operand.vmem [shape: f32[32,16], index: 1, kind: input, shape index: {}]   ;;  %s3546_s2 = inlined_call_operand.vmem [shape: f32[1,16], index: 2, kind: input, shape index: {}]   ;;  %s3547_s3 = inlined_call_operand.vmem [shape: f32[1,16], index: 3, kind: input, shape index: {}]   ;;  %s3548_s4 = inlined_call_operand.vmem [shape: f32[256,32], index: 4, kind: output, shape index: {0}]   ;;  %s3549_s5 = inlined_call_operand.vmem [shape: f32[256,3], index: 5, kind: output, shape index: {1}]  }
   0x1   :  { %s2523_s20 = smov 0  }
   0x2 LB: > { %s1887_s21 = sadd.s32 4294967295, %s2487_s20   ;;  %s2536_s22 = sadd.s32 1, %s2487_s20   ;;  %s2487_s20 = sphi %s2523_s20, %s3552_s20   ;;  %s2483_s19 = sphi %s2521_s19, %s3551_s19   ;;  %s2479_s18 = sphi %s2519_s18, %s3550_s18  }
   0x3   : > { %s20_s23 = ssub.s32 %s2487_s20, %s2536_s22  ;;  %s23_s24 = sadd.s32 1, %s2483_s19 }
   0x4   : > { %p21_p0 = scmp.eq.s32.totalorder %s20_s23, 0  ;;  %p30_p1 = scmp.ne.s32.totalorder %s2483_s19, %s2479_s18 }
   0x5   : > { %p31_p2 = scmp.eq.s32.totalorder %s2487_s20, 0  ;;  %p1890_p4 = scmp.ge.s32.totalorder %s2487_s20, 2 }
   0x6   : > { %s2545_s25 = scalar_select %p21_p0, %s2483_s19, %s23_s24  }
   0x7   : > { %p32_p3 = por %p31_p2, %p30_p1  ;;  %180 = sbr.rel (%p1890_p4) target bundleno = 43 (0x2b), region = 28 }
   0xe   : > { %183 = sbr.rel (!%p32_p3) target bundleno = 43 (0x2b), region = 32  ;;  %s185_s26 = sand.u32 (%p32_p3), 1, %s2483_s19  }
   0xf   : > { %s1982_s27 = sshll.u32 (%p32_p3), %s2487_s20, 7  ;;  %s2167_s28 = smul.u32 (%p32_p3), 384, %s185_s26 }
  0x10   : > { %s2553_s6 = scalar_lea.vmem (%p32_p3), %s3544_s0, %s1982_s27 }
  0x11   : > { %v312_v0 = vld [vmem:[%s2553_s6] sm:$0xff] (%p32_p3)  ;;  %v314_v1 = vld [vmem:[%s2553_s6 + $0x8] sm:$0xff] (%p32_p3)  ;;  %v316_v2 = vld [vmem:[%s2553_s6 + $0x10] sm:$0xff] (%p32_p3)  ;;  %s2561_s7 = scalar_lea.vmem (%p32_p3), [#allocation2], %s2167_s28 }
  0x12   : > { %v318_v3 = vld [vmem:[%s2553_s6 + $0x18] sm:$0xff] (%p32_p3)  ;;  %v320_v4 = vld [vmem:[%s2553_s6 + $0x20] sm:$0xff] (%p32_p3)  ;;  %v322_v5 = vld [vmem:[%s2553_s6 + $0x28] sm:$0xff] (%p32_p3)  ;;  %313 = vst [vmem:[%s2561_s7] sm:$0xff] (%p32_p3), %v312_v0 }
  0x13   : > { %315 = vst [vmem:[%s2561_s7 + $0x8] sm:$0xff] (%p32_p3), %v314_v1  ;;  %317 = vst [vmem:[%s2561_s7 + $0x10] sm:$0xff] (%p32_p3), %v316_v2  ;;  %v324_v6 = vld [vmem:[%s2553_s6 + $0x30] sm:$0xff] (%p32_p3)  ;;  %v326_v7 = vld [vmem:[%s2553_s6 + $0x38] sm:$0xff] (%p32_p3) }
  0x14   : > { %319 = vst [vmem:[%s2561_s7 + $0x18] sm:$0xff] (%p32_p3), %v318_v3  ;;  %321 = vst [vmem:[%s2561_s7 + $0x20] sm:$0xff] (%p32_p3), %v320_v4  ;;  %v328_v8 = vld [vmem:[%s2553_s6 + $0x40] sm:$0xff] (%p32_p3)  ;;  %v330_v9 = vld [vmem:[%s2553_s6 + $0x48] sm:$0xff] (%p32_p3) }
  0x15   : > { %323 = vst [vmem:[%s2561_s7 + $0x28] sm:$0xff] %v322_v5  ;;  %325 = vst [vmem:[%s2561_s7 + $0x30] sm:$0xff] %v324_v6  ;;  %v332_v10 = vld [vmem:[%s2553_s6 + $0x50] sm:$0xff]  ;;  %v334_v11 = vld [vmem:[%s2553_s6 + $0x58] sm:$0xff] }
  0x16   : > { %327 = vst [vmem:[%s2561_s7 + $0x38] sm:$0xff] %v326_v7  ;;  %329 = vst [vmem:[%s2561_s7 + $0x40] sm:$0xff] %v328_v8  ;;  %v336_v12 = vld [vmem:[%s2553_s6 + $0x60] sm:$0xff]  ;;  %v338_v13 = vld [vmem:[%s2553_s6 + $0x68] sm:$0xff] }
  0x17   : > { %331 = vst [vmem:[%s2561_s7 + $0x48] sm:$0xff] %v330_v9  ;;  %333 = vst [vmem:[%s2561_s7 + $0x50] sm:$0xff] %v332_v10  ;;  %v340_v14 = vld [vmem:[%s2553_s6 + $0x70] sm:$0xff]  ;;  %v342_v15 = vld [vmem:[%s2553_s6 + $0x78] sm:$0xff] }
  0x18   : > { %335 = vst [vmem:[%s2561_s7 + $0x58] sm:$0xff] %v334_v11  ;;  %337 = vst [vmem:[%s2561_s7 + $0x60] sm:$0xff] %v336_v12  ;;  %v344_v16 = vld [vmem:[%s2553_s6 + $0x100] sm:$0xff]  ;;  %v346_v17 = vld [vmem:[%s2553_s6 + $0x108] sm:$0xff] }
  0x19   : > { %339 = vst [vmem:[%s2561_s7 + $0x68] sm:$0xff] %v338_v13  ;;  %341 = vst [vmem:[%s2561_s7 + $0x70] sm:$0xff] %v340_v14  ;;  %v348_v18 = vld [vmem:[%s2553_s6 + $0x110] sm:$0xff]  ;;  %v350_v19 = vld [vmem:[%s2553_s6 + $0x118] sm:$0xff] }
  0x1a   : > { %343 = vst [vmem:[%s2561_s7 + $0x78] sm:$0xff] %v342_v15  ;;  %345 = vst [vmem:[%s2561_s7 + $0x80] sm:$0xff] %v344_v16  ;;  %v352_v20 = vld [vmem:[%s2553_s6 + $0x120] sm:$0xff]  ;;  %v354_v21 = vld [vmem:[%s2553_s6 + $0x128] sm:$0xff] }
  0x1b   : > { %347 = vst [vmem:[%s2561_s7 + $0x88] sm:$0xff] %v346_v17  ;;  %349 = vst [vmem:[%s2561_s7 + $0x90] sm:$0xff] %v348_v18  ;;  %v356_v22 = vld [vmem:[%s2553_s6 + $0x130] sm:$0xff]  ;;  %v358_v23 = vld [vmem:[%s2553_s6 + $0x138] sm:$0xff] }
  0x1c   : > { %351 = vst [vmem:[%s2561_s7 + $0x98] sm:$0xff] %v350_v19  ;;  %353 = vst [vmem:[%s2561_s7 + $0xa0] sm:$0xff] %v352_v20  ;;  %v360_v24 = vld [vmem:[%s2553_s6 + $0x140] sm:$0xff]  ;;  %v362_v25 = vld [vmem:[%s2553_s6 + $0x148] sm:$0xff] }
  0x1d   : > { %355 = vst [vmem:[%s2561_s7 + $0xa8] sm:$0xff] %v354_v21  ;;  %357 = vst [vmem:[%s2561_s7 + $0xb0] sm:$0xff] %v356_v22  ;;  %v364_v26 = vld [vmem:[%s2553_s6 + $0x150] sm:$0xff]  ;;  %v366_v27 = vld [vmem:[%s2553_s6 + $0x158] sm:$0xff] }
  0x1e   : > { %359 = vst [vmem:[%s2561_s7 + $0xb8] sm:$0xff] %v358_v23  ;;  %361 = vst [vmem:[%s2561_s7 + $0xc0] sm:$0xff] %v360_v24  ;;  %v368_v28 = vld [vmem:[%s2553_s6 + $0x160] sm:$0xff]  ;;  %v370_v29 = vld [vmem:[%s2553_s6 + $0x168] sm:$0xff] }
  0x1f   : > { %363 = vst [vmem:[%s2561_s7 + $0xc8] sm:$0xff] %v362_v25  ;;  %365 = vst [vmem:[%s2561_s7 + $0xd0] sm:$0xff] %v364_v26  ;;  %v372_v30 = vld [vmem:[%s2553_s6 + $0x170] sm:$0xff]  ;;  %v374_v31 = vld [vmem:[%s2553_s6 + $0x178] sm:$0xff] }
  0x20   : > { %367 = vst [vmem:[%s2561_s7 + $0xd8] sm:$0xff] %v366_v27  ;;  %369 = vst [vmem:[%s2561_s7 + $0xe0] sm:$0xff] %v368_v28  ;;  %v376_v32 = vld [vmem:[%s2553_s6 + $0x200] sm:$0xff]  ;;  %v378_v33 = vld [vmem:[%s2553_s6 + $0x208] sm:$0xff] }
  0x21   : > { %371 = vst [vmem:[%s2561_s7 + $0xe8] sm:$0xff] %v370_v29  ;;  %373 = vst [vmem:[%s2561_s7 + $0xf0] sm:$0xff] %v372_v30  ;;  %v380_v34 = vld [vmem:[%s2553_s6 + $0x210] sm:$0xff]  ;;  %v382_v35 = vld [vmem:[%s2553_s6 + $0x218] sm:$0xff] }
  0x22   : > { %375 = vst [vmem:[%s2561_s7 + $0xf8] sm:$0xff] %v374_v31  ;;  %377 = vst [vmem:[%s2561_s7 + $0x100] sm:$0xff] %v376_v32  ;;  %v384_v36 = vld [vmem:[%s2553_s6 + $0x220] sm:$0xff]  ;;  %v386_v37 = vld [vmem:[%s2553_s6 + $0x228] sm:$0xff] }
  0x23   : > { %379 = vst [vmem:[%s2561_s7 + $0x108] sm:$0xff] %v378_v33  ;;  %381 = vst [vmem:[%s2561_s7 + $0x110] sm:$0xff] %v380_v34  ;;  %v388_v38 = vld [vmem:[%s2553_s6 + $0x230] sm:$0xff]  ;;  %v390_v39 = vld [vmem:[%s2553_s6 + $0x238] sm:$0xff] }
  0x24   : > { %383 = vst [vmem:[%s2561_s7 + $0x118] sm:$0xff] %v382_v35  ;;  %385 = vst [vmem:[%s2561_s7 + $0x120] sm:$0xff] %v384_v36  ;;  %v392_v40 = vld [vmem:[%s2553_s6 + $0x240] sm:$0xff]  ;;  %v394_v41 = vld [vmem:[%s2553_s6 + $0x248] sm:$0xff] }
  0x25   : > { %387 = vst [vmem:[%s2561_s7 + $0x128] sm:$0xff] %v386_v37  ;;  %389 = vst [vmem:[%s2561_s7 + $0x130] sm:$0xff] %v388_v38  ;;  %v396_v42 = vld [vmem:[%s2553_s6 + $0x250] sm:$0xff]  ;;  %v398_v43 = vld [vmem:[%s2553_s6 + $0x258] sm:$0xff] }
  0x26   : > { %391 = vst [vmem:[%s2561_s7 + $0x138] sm:$0xff] %v390_v39  ;;  %393 = vst [vmem:[%s2561_s7 + $0x140] sm:$0xff] %v392_v40  ;;  %v400_v44 = vld [vmem:[%s2553_s6 + $0x260] sm:$0xff]  ;;  %v402_v45 = vld [vmem:[%s2553_s6 + $0x268] sm:$0xff] }
  0x27   : > { %395 = vst [vmem:[%s2561_s7 + $0x148] sm:$0xff] %v394_v41  ;;  %397 = vst [vmem:[%s2561_s7 + $0x150] sm:$0xff] %v396_v42  ;;  %v404_v46 = vld [vmem:[%s2553_s6 + $0x270] sm:$0xff]  ;;  %v406_v47 = vld [vmem:[%s2553_s6 + $0x278] sm:$0xff] }
  0x28   : > { %399 = vst [vmem:[%s2561_s7 + $0x158] sm:$0xff] %v398_v43  ;;  %401 = vst [vmem:[%s2561_s7 + $0x160] sm:$0xff] %v400_v44 }
  0x29   : > { %403 = vst [vmem:[%s2561_s7 + $0x168] sm:$0xff] %v402_v45  ;;  %405 = vst [vmem:[%s2561_s7 + $0x170] sm:$0xff] %v404_v46 }
  0x2a   : > { %407 = vst [vmem:[%s2561_s7 + $0x178] sm:$0xff] %v406_v47 }
  0x2b PF: > { %p1893_p5 = scmp.ge.s32.totalorder %s2487_s20, 1  ;;  %p412_p6 = scmp.lt.s32.totalorder %s2487_s20, 3 }
  0x2d   : > { %p413_p7 = pnand %p1893_p5, %p412_p6 }
  0x2e   : > { %v464_v48 = vld [vmem:[%s3545_s1] sm:$0xff] (!%p413_p7)  ;;  %v465_v49 = vld [vmem:[%s3545_s1 + $0x8] sm:$0xff] (!%p413_p7)  ;;  %v466_v50 = vld [vmem:[%s3545_s1 + $0x10] sm:$0xff] (!%p413_p7)  ;;  %s419_s14 = sand.u32 (!%p413_p7), 1, %s2479_s18   ;;  %vm498_vm0 = vcmask (!%p413_p7), 261120   ;;  %vm724_vm1 = vcmask (!%p413_p7), 130048  }
  0x2f   : > { %416 = sbr.rel (%p413_p7) target bundleno = 588 (0x24c), region = 70  ;;  %v2139_v51 = vpack.c.bf16 (!%p413_p7), %v465_v49, %v464_v48  ;;  %v467_v52 = vld [vmem:[%s3545_s1 + $0x18] sm:$0xff] (!%p413_p7)  ;;  %v2769_v38 = vld [vmem:[%s3546_s2] ss:$0 sm:$0xff] (!%p413_p7)  ;;  %s3029_s28 = sshll.u32 (!%p413_p7), %s1887_s21, 4  ;;  %vm1774_vm2 = vcmask (!%p413_p7), 23552  }
  0x30   : > { %s2168_s17 = smul.u32 (!%p413_p7), 384, %s419_s14  ;;  %v2143_v53 = vpack.c.bf16 (!%p413_p7), %v467_v52, %v466_v50  ;;  %p453_p8 = scmp.lt.s32.totalorder (!%p413_p7), %s3029_s28, 31 }
  0x31   : > { %2140 = vmatprep.subr.bf16.mxu0 (!%p413_p7), %v2139_v51  ;;  %2163 = vmatprep.subr.bf16.mxu1 (!%p413_p7), %v2139_v51 }
  0x32   : > { %2142 = vmatpush3.bf16.msra.mxu0 (!%p413_p7), %v2139_v51  ;;  %2165 = vmatpush3.bf16.msra.mxu1 (!%p413_p7), %v2139_v51  ;;  %s2668_s23 = scalar_lea.vmem (!%p413_p7), [#allocation2], %s2168_s17 }
  0x33   : > { %v482_v54 = vld [vmem:[%s2668_s23] sm:$0xff] (!%p413_p7)  ;;  %2144 = vmatprep.subr.bf16.mxu0 (!%p413_p7), %v2143_v53  ;;  %2164 = vmatprep.subr.bf16.mxu1 (!%p413_p7), %v2143_v53  ;;  %v483_v56 = vld [vmem:[%s2668_s23 + $0x8] sm:$0xff] (!%p413_p7)  ;;  %v484_v58 = vld [vmem:[%s2668_s23 + $0x10] sm:$0xff] (!%p413_p7) }
  0x34   : > { %v490_v55 = vld [vmem:[%s2668_s23 + $0x40] sm:$0xff] (!%p413_p7)  ;;  %2051 = vmatprep.mubr.msk.f32.mxu0 (!%p413_p7), %vm498_vm0, %v482_v54  ;;  %v491_v57 = vld [vmem:[%s2668_s23 + $0x48] sm:$0xff] (!%p413_p7)  ;;  %v492_v59 = vld [vmem:[%s2668_s23 + $0x50] sm:$0xff] (!%p413_p7) }
  0x35   : > { %2063 = vmatprep.mubr.msk.f32.mxu1 (!%p413_p7), %vm498_vm0, %v490_v55  ;;  %v485_v60 = vld [vmem:[%s2668_s23 + $0x18] sm:$0xff] (!%p413_p7)  ;;  %v486_v62 = vld [vmem:[%s2668_s23 + $0x20] sm:$0xff] (!%p413_p7)  ;;  %v487_v0 = vld [vmem:[%s2668_s23 + $0x28] sm:$0xff] (!%p413_p7) }
  0x36   : > { %2146 = vmatpush3.bf16.msra.mxu0 %v2143_v53  ;;  %2166 = vmatpush3.bf16.msra.mxu1 %v2143_v53  ;;  %v493_v61 = vld [vmem:[%s2668_s23 + $0x58] sm:$0xff]  ;;  %v494_v63 = vld [vmem:[%s2668_s23 + $0x60] sm:$0xff]  ;;  %v495_v1 = vld [vmem:[%s2668_s23 + $0x68] sm:$0xff]  ;;  %s3554_s28 = smov (!%p453_p8, %s3029_s28), 31 }
  0x37   : > { %2148 = vmatprep.subr.bf16.mxu1 %v2139_v51  ;;  %2156 = vmatprep.subr.bf16.mxu0 %v2139_v51  ;;  %v488_v2 = vld [vmem:[%s2668_s23 + $0x30] sm:$0xff]  ;;  %v489_v4 = vld [vmem:[%s2668_s23 + $0x38] sm:$0xff]  ;;  %v1916_v6 = vld [vmem:[%s2668_s23 + $0x80] sm:$0xff]  ;;  %s1895_s20 = sshll.u32 %s3554_s28, 3 }
  0x38   : > { %v496_v3 = vld [vmem:[%s2668_s23 + $0x70] sm:$0xff]  ;;  %v497_v5 = vld [vmem:[%s2668_s23 + $0x78] sm:$0xff]  ;;  %v1948_v7 = vld [vmem:[%s2668_s23 + $0x100] sm:$0xff]  ;;  %s3106_s30 = scalar_lea.vmem %s3549_s5, %s1895_s20  ;;  %s3133_s8 = scalar_lea.vmem %s3548_s4, %s1895_s20 }
  0x39   : > { %2052 = vmatmul.mubr.msk.f32.vlgmr.msra.gmra.mrb[0].mxu0 %vm498_vm0, %v483_v56  ;;  %2064 = vmatmul.mubr.msk.f32.vlgmr.msra.gmra.mrb[0].mxu1 %vm498_vm0, %v491_v57  ;;  %v1917_v8 = vld [vmem:[%s2668_s23 + $0x88] sm:$0xff]  ;;  %v1918_v10 = vld [vmem:[%s2668_s23 + $0x90] sm:$0xff]  ;;  %v1919_v12 = vld [vmem:[%s2668_s23 + $0x98] sm:$0xff] }
  0x3a   : > { %2054 = vmatprep.mubr.msk.f32.mxu0 %vm498_vm0, %v484_v58  ;;  %2066 = vmatprep.mubr.msk.f32.mxu1 %vm498_vm0, %v492_v59  ;;  %v1949_v9 = vld [vmem:[%s2668_s23 + $0x108] sm:$0xff]  ;;  %v1950_v11 = vld [vmem:[%s2668_s23 + $0x110] sm:$0xff]  ;;  %v1951_v13 = vld [vmem:[%s2668_s23 + $0x118] sm:$0xff] }
  0x3b   : > { %2150 = vmatpush3.bf16.msra.mxu1 %v2139_v51  ;;  %2158 = vmatpush3.bf16.msra.mxu0 %v2139_v51  ;;  %v1920_v14 = vld [vmem:[%s2668_s23 + $0xa0] sm:$0xff]  ;;  %v1921_v16 = vld [vmem:[%s2668_s23 + $0xa8] sm:$0xff]  ;;  %v1922_v18 = vld [vmem:[%s2668_s23 + $0xb0] sm:$0xff] }
  0x3c   : > { %2152 = vmatprep.subr.bf16.mxu1 %v2143_v53  ;;  %2160 = vmatprep.subr.bf16.mxu0 %v2143_v53  ;;  %v1952_v15 = vld [vmem:[%s2668_s23 + $0x120] sm:$0xff]  ;;  %v1953_v17 = vld [vmem:[%s2668_s23 + $0x128] sm:$0xff]  ;;  %v1954_v19 = vld [vmem:[%s2668_s23 + $0x130] sm:$0xff] }
  0x3d   : > { %2055 = vmatmul.mubr.msk.f32.gmra.mrb[2].mxu0 %vm498_vm0, %v485_v60  ;;  %2067 = vmatmul.mubr.msk.f32.gmra.mrb[2].mxu1 %vm498_vm0, %v493_v61  ;;  %v1923_v20 = vld [vmem:[%s2668_s23 + $0xb8] sm:$0xff]  ;;  %v1924_v22 = vld [vmem:[%s2668_s23 + $0xc0] sm:$0xff]  ;;  %v1925_v24 = vld [vmem:[%s2668_s23 + $0xc8] sm:$0xff] }
  0x3e   : > { %2057 = vmatprep.mubr.msk.f32.mxu0 %vm498_vm0, %v486_v62  ;;  %2069 = vmatprep.mubr.msk.f32.mxu1 %vm498_vm0, %v494_v63  ;;  %v1955_v21 = vld [vmem:[%s2668_s23 + $0x138] sm:$0xff]  ;;  %v1956_v23 = vld [vmem:[%s2668_s23 + $0x140] sm:$0xff]  ;;  %v1957_v25 = vld [vmem:[%s2668_s23 + $0x148] sm:$0xff] }
  0x3f   : > { %2154 = vmatpush3.bf16.msra.mxu1 %v2143_v53  ;;  %2162 = vmatpush3.bf16.msra.mxu0 %v2143_v53  ;;  %v1926_v26 = vld [vmem:[%s2668_s23 + $0xd0] sm:$0xff]  ;;  %v1927_v28 = vld [vmem:[%s2668_s23 + $0xd8] sm:$0xff]  ;;  %v1928_v30 = vld [vmem:[%s2668_s23 + $0xe0] sm:$0xff] }
  0x40   : > { %v1958_v27 = vld [vmem:[%s2668_s23 + $0x150] sm:$0xff]  ;;  %v1959_v29 = vld [vmem:[%s2668_s23 + $0x158] sm:$0xff]  ;;  %v1960_v31 = vld [vmem:[%s2668_s23 + $0x160] sm:$0xff] }
  0x41   : > { %2058 = vmatmul.mubr.msk.f32.gmra.mrb[4].mxu0 %vm498_vm0, %v487_v0  ;;  %2070 = vmatmul.mubr.msk.f32.gmra.mrb[4].mxu1 %vm498_vm0, %v495_v1  ;;  %v1929_v32 = vld [vmem:[%s2668_s23 + $0xe8] sm:$0xff]  ;;  %v1930_v34 = vld [vmem:[%s2668_s23 + $0xf0] sm:$0xff]  ;;  %v1931_v36 = vld [vmem:[%s2668_s23 + $0xf8] sm:$0xff] }
  0x42   : > { %2060 = vmatprep.mubr.msk.f32.mxu0 %vm498_vm0, %v488_v2  ;;  %2072 = vmatprep.mubr.msk.f32.mxu1 %vm498_vm0, %v496_v3  ;;  %v1961_v33 = vld [vmem:[%s2668_s23 + $0x168] sm:$0xff]  ;;  %v1962_v35 = vld [vmem:[%s2668_s23 + $0x170] sm:$0xff]  ;;  %v1963_v37 = vld [vmem:[%s2668_s23 + $0x178] sm:$0xff] }
  0x43   : > { %v2784_v61 = vld [vmem:[%s3547_s3] ss:$0 sm:$0xff] }
  0x45   : > { %2061 = vmatmul.mubr.msk.f32.gmra.mrb[6].mxu0 %vm498_vm0, %v489_v4  ;;  %2073 = vmatmul.mubr.msk.f32.gmra.mrb[6].mxu1 %vm498_vm0, %v497_v5 }
  0x46   : > { %2083 = vmatprep.mubr.msk.f32.mxu1 %vm498_vm0, %v1916_v6  ;;  %2115 = vmatprep.mubr.msk.f32.mxu0 %vm498_vm0, %v1948_v7 }
  0x49   : > { %2084 = vmatmul.mubr.msk.f32.vlgmr.msra.gmra.mrb[8].mxu1 %vm498_vm0, %v1917_v8  ;;  %2116 = vmatmul.mubr.msk.f32.vlgmr.msra.gmra.mrb[8].mxu0 %vm498_vm0, %v1949_v9 }
  0x4a   : > { %2086 = vmatprep.mubr.msk.f32.mxu1 %vm498_vm0, %v1918_v10  ;;  %2118 = vmatprep.mubr.msk.f32.mxu0 %vm498_vm0, %v1950_v11 }
  0x4d   : > { %2087 = vmatmul.mubr.msk.f32.gmra.mrb[10].mxu1 %vm498_vm0, %v1919_v12  ;;  %2119 = vmatmul.mubr.msk.f32.gmra.mrb[10].mxu0 %vm498_vm0, %v1951_v13 }
  0x4e   : > { %2089 = vmatprep.mubr.msk.f32.mxu1 %vm498_vm0, %v1920_v14  ;;  %2121 = vmatprep.mubr.msk.f32.mxu0 %vm498_vm0, %v1952_v15 }
  0x51   : > { %2090 = vmatmul.mubr.msk.f32.gmra.mrb[12].mxu1 %vm498_vm0, %v1921_v16  ;;  %2122 = vmatmul.mubr.msk.f32.gmra.mrb[12].mxu0 %vm498_vm0, %v1953_v17 }
  0x52   : > { %2092 = vmatprep.mubr.msk.f32.mxu1 %vm498_vm0, %v1922_v18  ;;  %2124 = vmatprep.mubr.msk.f32.mxu0 %vm498_vm0, %v1954_v19 }
  0x55   : > { %2093 = vmatmul.mubr.msk.f32.gmra.mrb[14].mxu1 %vm498_vm0, %v1923_v20  ;;  %2125 = vmatmul.mubr.msk.f32.gmra.mrb[14].mxu0 %vm498_vm0, %v1955_v21 }
  0x56   : > { %2095 = vmatprep.mubr.msk.f32.mxu1 %vm498_vm0, %v1924_v22  ;;  %2127 = vmatprep.mubr.msk.f32.mxu0 %vm498_vm0, %v1956_v23 }
  0x59   : > { %2096 = vmatmul.mubr.msk.f32.gmra.mrb[16].mxu1 %vm498_vm0, %v1925_v24  ;;  %2128 = vmatmul.mubr.msk.f32.gmra.mrb[16].mxu0 %vm498_vm0, %v1957_v25 }
  0x5a   : > { %2098 = vmatprep.mubr.msk.f32.mxu1 %vm498_vm0, %v1926_v26  ;;  %2130 = vmatprep.mubr.msk.f32.mxu0 %vm498_vm0, %v1958_v27 }
  0x5d   : > { %2099 = vmatmul.mubr.msk.f32.gmra.mrb[18].mxu1 %vm498_vm0, %v1927_v28  ;;  %2131 = vmatmul.mubr.msk.f32.gmra.mrb[18].mxu0 %vm498_vm0, %v1959_v29 }
  0x5e   : > { %2101 = vmatprep.mubr.msk.f32.mxu1 %vm498_vm0, %v1928_v30  ;;  %2133 = vmatprep.mubr.msk.f32.mxu0 %vm498_vm0, %v1960_v31 }
  0x61   : > { %2102 = vmatmul.mubr.msk.f32.gmra.mrb[20].mxu1 %vm498_vm0, %v1929_v32  ;;  %2134 = vmatmul.mubr.msk.f32.gmra.mrb[20].mxu0 %vm498_vm0, %v1961_v33 }
  0x62   : > { %2104 = vmatprep.mubr.msk.f32.mxu1 %vm498_vm0, %v1930_v34  ;;  %2136 = vmatprep.mubr.msk.f32.mxu0 %vm498_vm0, %v1962_v35 }
  0x65   : > { %2105 = vmatmul.mubr.msk.f32.gmra.mrb[22].mxu1 %vm498_vm0, %v1931_v36  ;;  %2137 = vmatmul.mubr.msk.f32.gmra.mrb[22].mxu0 %vm498_vm0, %v1963_v37 }
 0x10c   : > { %v2053_v39 = vpop.f32.mrb[0].mxu0  ;;  %v2065_v40 = vpop.f32.mrb[0].mxu1 }
 0x10d   : > { %v619_v41 = vadd.f32 %v2053_v39, %v2769_v38  ;;  %v659_v42 = vadd.f32 %v2065_v40, %v2769_v38  ;;  %v613_v43 = vpop.f32.mrb[1].mxu0  ;;  %v653_v44 = vpop.f32.mrb[1].mxu1 }
 0x10e   : > { %v614_v45 = vadd.f32 %v2769_v38, %v613_v43  ;;  %v654_v46 = vadd.f32 %v2769_v38, %v653_v44 }
 0x10f   : > { %2193 = vtanh.f32 %v619_v41 }
 0x110   : > { %2195 = vtanh.f32 %v659_v42  ;;  %v2056_v47 = vpop.f32.mrb[2].mxu0  ;;  %v2068_v48 = vpop.f32.mrb[2].mxu1 }
 0x111   : > { %2197 = vtanh.f32 %v614_v45  ;;  %v629_v49 = vadd.f32 %v2056_v47, %v2769_v38  ;;  %v623_v50 = vpop.f32.mrb[3].mxu0  ;;  %v669_v51 = vadd.f32 %v2068_v48, %v2769_v38  ;;  %v663_v52 = vpop.f32.mrb[3].mxu1 }
 0x112   : > { %2199 = vtanh.f32 %v654_v46  ;;  %v664_v53 = vadd.f32 %v2769_v38, %v663_v52  ;;  %v624_v54 = vadd.f32 %v2769_v38, %v623_v50 }
 0x113   : > { %2201 = vtanh.f32 %v629_v49 }
 0x114   : > { %v2059_v55 = vpop.f32.mrb[4].mxu0  ;;  %v2071_v56 = vpop.f32.mrb[4].mxu1  ;;  %2203 = vtanh.f32 %v669_v51 }
 0x115   : > { %v633_v57 = vpop.f32.mrb[5].mxu0  ;;  %v673_v58 = vpop.f32.mrb[5].mxu1  ;;  %v639_v59 = vadd.f32 %v2059_v55, %v2769_v38  ;;  %2205 = vtanh.f32 %v664_v53  ;;  %v679_v62 = vadd.f32 %v2071_v56, %v2769_v38 }
 0x116   : > { %v634_v60 = vadd.f32 %v2769_v38, %v633_v57  ;;  %2207 = vtanh.f32 %v624_v54  ;;  %v674_v2 = vadd.f32 %v2769_v38, %v673_v58 }
 0x118   : > { %v2062_v63 = vpop.f32.mrb[6].mxu0  ;;  %v2074_v0 = vpop.f32.mrb[6].mxu1  ;;  %2209 = vtanh.f32 %v634_v60 }
 0x119   : > { %v2194_v1 = vpop.eup %2193  ;;  %v643_v3 = vpop.f32.mrb[7].mxu0  ;;  %2211 = vtanh.f32 %v639_v59  ;;  %v649_v7 = vadd.f32 %v2062_v63, %v2769_v38  ;;  %v689_v18 = vadd.f32 %v2074_v0, %v2769_v38 }
 0x11a   : > { %v683_v4 = vpop.f32.mrb[7].mxu1  ;;  %v2196_v5 = vpop.eup %2195  ;;  %v709_v6 = vmul.f32 %v2194_v1, %v2784_v61  ;;  %v644_v10 = vadd.f32 %v2769_v38, %v643_v3  ;;  %2213 = vtanh.f32 %v679_v62 }
 0x11b   : > { %v2198_v8 = vpop.eup %2197  ;;  %v717_v9 = vmul.f32 %v2196_v5, %v2784_v61  ;;  %2215 = vtanh.f32 %v674_v2  ;;  %v684_v22 = vadd.f32 %v2769_v38, %v683_v4 }
 0x11c   : > { %v2200_v11 = vpop.eup %2199  ;;  %v728_v12 = vsel %vm724_vm1, %v709_v6, 0.0  ;;  %v708_v13 = vmul.f32 %v2198_v8, %v2784_v61  ;;  %v2085_v14 = vpop.f32.mrb[8].mxu1  ;;  %2217 = vtanh.f32 %v649_v7 }
 0x11d   : > { %v2117_v15 = vpop.f32.mrb[8].mxu0  ;;  %v2202_v16 = vpop.eup %2201  ;;  %v752_v17 = vsel %vm724_vm1, %v717_v9, 0.0  ;;  %729 = vadd.xlane.f32.xlu0 %v728_v12  ;;  %2219 = vtanh.f32 %v644_v10  ;;  %v716_v24 = vmul.f32 %v2200_v11, %v2784_v61  ;;  %v910_v25 = vadd.f32 %v2085_v14, %v2769_v38 }
 0x11e   : > { %v904_v19 = vpop.f32.mrb[9].mxu1  ;;  %v1194_v20 = vpop.f32.mrb[9].mxu0  ;;  %753 = vadd.xlane.f32.xlu1 %v752_v17  ;;  %v711_v21 = vmul.f32 %v2202_v16, %v2784_v61  ;;  %v725_v27 = vsel %vm724_vm1, %v708_v13, 0.0  ;;  %2221 = vtanh.f32 %v689_v18  ;;  %v1200_v33 = vadd.f32 %v2117_v15, %v2769_v38 }
 0x11f   : > { %v2204_v23 = vpop.eup %2203  ;;  %v905_v29 = vadd.f32 %v2769_v38, %v904_v19  ;;  %2223 = vtanh.f32 %v684_v22  ;;  %v1195_v37 = vadd.f32 %v2769_v38, %v1194_v20  ;;  %v749_v43 = vsel %vm724_vm1, %v716_v24, 0.0 }
 0x120   : > { %v734_v26 = vsel %vm724_vm1, %v711_v21, 0.0  ;;  %v719_v28 = vmul.f32 %v2204_v23, %v2784_v61  ;;  %v2088_v30 = vpop.f32.mrb[10].mxu1  ;;  %v2120_v31 = vpop.f32.mrb[10].mxu0  ;;  %2225 = vtanh.f32 %v910_v25 }
 0x121   : > { %v2206_v32 = vpop.eup %2205  ;;  %726 = vadd.xlane.f32.xlu0 %v725_v27  ;;  %v914_v34 = vpop.f32.mrb[11].mxu1  ;;  %v920_v41 = vadd.f32 %v2088_v30, %v2769_v38  ;;  %2227 = vtanh.f32 %v905_v29  ;;  %v1210_v49 = vadd.f32 %v2120_v31, %v2769_v38 }
 0x122   : > { %v1204_v35 = vpop.f32.mrb[11].mxu0  ;;  %v2208_v36 = vpop.eup %2207  ;;  %735 = vadd.xlane.f32.xlu1 %v734_v26  ;;  %v758_v40 = vsel %vm724_vm1, %v719_v28, 0.0  ;;  %v718_v44 = vmul.f32 %v2206_v32, %v2784_v61  ;;  %v915_v45 = vadd.f32 %v2769_v38, %v914_v34  ;;  %2229 = vtanh.f32 %v1200_v33 }
 0x123   : > { %v2210_v39 = vpop.eup %2209  ;;  %v710_v48 = vmul.f32 %v2208_v36, %v2784_v61  ;;  %2231 = vtanh.f32 %v1195_v37  ;;  %v1205_v54 = vadd.f32 %v2769_v38, %v1204_v35 }
 0x124   : > { %v2212_v42 = vpop.eup %2211  ;;  %v2091_v46 = vpop.f32.mrb[12].mxu1  ;;  %v712_v53 = vmul.f32 %v2210_v39, %v2784_v61  ;;  %2233 = vtanh.f32 %v920_v41  ;;  %v755_v59 = vsel %vm724_vm1, %v718_v44, 0.0 }
 0x125   : > { %v2123_v47 = vpop.f32.mrb[12].mxu0  ;;  %750 = vadd.xlane.f32.xlu0 %v749_v43  ;;  %v924_v50 = vpop.f32.mrb[13].mxu1  ;;  %v713_v56 = vmul.f32 %v2212_v42, %v2784_v61  ;;  %v930_v57 = vadd.f32 %v2091_v46, %v2769_v38  ;;  %2235 = vtanh.f32 %v915_v45  ;;  %v731_v1 = vsel %vm724_vm1, %v710_v48, 0.0 }
 0x126   : > { %v1214_v51 = vpop.f32.mrb[13].mxu0  ;;  %v2214_v52 = vpop.eup %2213  ;;  %759 = vadd.xlane.f32.xlu1 %v758_v40  ;;  %v925_v60 = vadd.f32 %v2769_v38, %v924_v50  ;;  %2237 = vtanh.f32 %v1210_v49  ;;  %v1220_v2 = vadd.f32 %v2123_v47, %v2769_v38  ;;  %v737_v5 = vsel %vm724_vm1, %v712_v53, 0.0 }
 0x127   : > { %v2216_v55 = vpop.eup %2215  ;;  %2239 = vtanh.f32 %v1205_v54  ;;  %v1215_v7 = vadd.f32 %v2769_v38, %v1214_v51  ;;  %v740_v9 = vsel %vm724_vm1, %v713_v56, 0.0  ;;  %v721_v10 = vmul.f32 %v2214_v52, %v2784_v61 }
 0x128   : > { %v2218_v58 = vpop.eup %2217  ;;  %v2819_v62 = vpop.f32.mrb[14].mxu1  ;;  %v720_v6 = vmul.f32 %v2216_v55, %v2784_v61  ;;  %2241 = vtanh.f32 %v930_v57 }
 0x129   : > { %v2821_v63 = vpop.f32.mrb[14].mxu0  ;;  %v2220_v0 = vpop.eup %2219  ;;  %756 = vadd.xlane.f32.xlu0 %v755_v59  ;;  %2243 = vtanh.f32 %v925_v60  ;;  %v764_v23 = vsel %vm724_vm1, %v721_v10, 0.0  ;;  %v715_v24 = vmul.f32 %v2218_v58, %v2784_v61  ;;  %v940_v60 = vadd.f32 %v2819_v62, %v2769_v38 }
 0x12a   : > { %v2825_v3 = vpop.f32.mrb[15].mxu1  ;;  %v2827_v4 = vpop.f32.mrb[15].mxu0  ;;  %732 = vadd.xlane.f32.xlu1 %v731_v1  ;;  %2245 = vtanh.f32 %v1220_v2  ;;  %v761_v19 = vsel %vm724_vm1, %v720_v6, 0.0  ;;  %v714_v20 = vmul.f32 %v2220_v0, %v2784_v61 }
 0x12b   : > { %v2222_v8 = vpop.eup %2221  ;;  %2247 = vtanh.f32 %v1215_v7  ;;  %v746_v40 = vsel %vm724_vm1, %v715_v24, 0.0  ;;  %v935_v0 = vadd.f32 %v2769_v38, %v2825_v3 }
 0x12c   : > { %v2224_v11 = vpop.eup %2223  ;;  %v2097_v12 = vpop.f32.mrb[16].mxu1  ;;  %v743_v35 = vsel %vm724_vm1, %v714_v20, 0.0  ;;  %v723_v41 = vmul.f32 %v2222_v8, %v2784_v61 }
 0x12d   : > { %v2129_v13 = vpop.f32.mrb[16].mxu0  ;;  %v2226_v14 = vpop.eup %2225  ;;  %738 = vadd.xlane.f32.xlu0 %v737_v5  ;;  %v950_v15 = vadd.f32 %v2097_v12, %v2769_v38  ;;  %v722_v36 = vmul.f32 %v2224_v11, %v2784_v61 }
 0x12e   : > { %v944_v16 = vpop.f32.mrb[17].mxu1  ;;  %v1234_v17 = vpop.f32.mrb[17].mxu0  ;;  %741 = vadd.xlane.f32.xlu1 %v740_v9  ;;  %v1240_v25 = vadd.f32 %v2129_v13, %v2769_v38  ;;  %v1000_v48 = vmul.f32 %v2226_v14, %v2784_v61  ;;  %v770_v57 = vsel %vm724_vm1, %v723_v41, 0.0 }
 0x12f   : > { %v2228_v18 = vpop.eup %2227  ;;  %v945_v21 = vadd.f32 %v2769_v38, %v944_v16  ;;  %2249 = vtanh.f32 %v950_v15  ;;  %v1235_v27 = vadd.f32 %v2769_v38, %v1234_v17  ;;  %v767_v53 = vsel %vm724_vm1, %v722_v36, 0.0 }
 0x130   : > { %v2838_v22 = vpop.eup %2229  ;;  %v2100_v28 = vpop.f32.mrb[18].mxu1  ;;  %v999_v54 = vmul.f32 %v2228_v18, %v2784_v61  ;;  %v1018_v7 = vsel %vm724_vm1, %v1000_v48, 0.0 }
 0x131   : > { %v2232_v26 = vpop.eup %2231  ;;  %2251 = vtanh.f32 %v945_v21  ;;  %v2132_v29 = vpop.f32.mrb[18].mxu0  ;;  %762 = vadd.xlane.f32.xlu0 %v761_v19  ;;  %v960_v31 = vadd.f32 %v2100_v28, %v2769_v38  ;;  %v1290_v15 = vmul.f32 %v2838_v22, %v2784_v61 }
 0x132   : > { %v2844_v30 = vpop.eup %2233  ;;  %2253 = vtanh.f32 %v1240_v25  ;;  %v954_v32 = vpop.f32.mrb[19].mxu1  ;;  %765 = vadd.xlane.f32.xlu1 %v764_v23  ;;  %v1250_v42 = vadd.f32 %v2132_v29, %v2769_v38  ;;  %v1289_v8 = vmul.f32 %v2232_v26, %v2784_v61  ;;  %v1015_v3 = vsel %vm724_vm1, %v999_v54, 0.0 }
 0x133   : > { %v1244_v33 = vpop.f32.mrb[19].mxu0  ;;  %v2847_v34 = vpop.eup %2235  ;;  %2255 = vtanh.f32 %v1235_v27  ;;  %v955_v37 = vadd.f32 %v2769_v38, %v954_v32  ;;  %v1308_v32 = vsel %vm724_vm1, %v1290_v15, 0.0 }
 0x134   : > { %v2852_v39 = vpop.eup %2237  ;;  %2257 = vtanh.f32 %v960_v31  ;;  %v1245_v44 = vadd.f32 %v2769_v38, %v1244_v33  ;;  %v2103_v45 = vpop.f32.mrb[20].mxu1  ;;  %v1305_v24 = vsel %vm724_vm1, %v1289_v8, 0.0  ;;  %v1001_v27 = vmul.f32 %v2847_v34, %v2784_v61 }
 0x135   : > { %v2857_v43 = vpop.eup %2239  ;;  %2259 = vtanh.f32 %v955_v37  ;;  %v2135_v46 = vpop.f32.mrb[20].mxu0  ;;  %744 = vadd.xlane.f32.xlu0 %v743_v35  ;;  %v970_v49 = vadd.f32 %v2103_v45, %v2769_v38  ;;  %v1002_v33 = vmul.f32 %v2844_v30, %v2784_v61  ;;  %v1230_v34 = vadd.f32 %v2821_v63, %v2769_v38 }
 0x136   : > { %v2860_v47 = vpop.eup %2241  ;;  %2261 = vtanh.f32 %v1250_v42  ;;  %v964_v50 = vpop.f32.mrb[21].mxu1  ;;  %747 = vadd.xlane.f32.xlu1 %v746_v40  ;;  %v1260_v58 = vadd.f32 %v2135_v46, %v2769_v38  ;;  %v1225_v30 = vadd.f32 %v2769_v38, %v2827_v4  ;;  %v1021_v63 = vsel %vm724_vm1, %v1001_v27, 0.0 }
 0x137   : > { %v1254_v51 = vpop.f32.mrb[21].mxu0  ;;  %v2864_v52 = vpop.eup %2243  ;;  %2263 = vtanh.f32 %v1245_v44  ;;  %v965_v55 = vadd.f32 %v2769_v38, %v964_v50  ;;  %v1291_v48 = vmul.f32 %v2857_v43, %v2784_v61  ;;  %v1292_v4 = vmul.f32 %v2852_v39, %v2784_v61 }
 0x138   : > { %v2869_v56 = vpop.eup %2245  ;;  %2265 = vtanh.f32 %v970_v49  ;;  %v1255_v1 = vadd.f32 %v2769_v38, %v1254_v51  ;;  %v2106_v2 = vpop.f32.mrb[22].mxu1 }
 0x139   : > { %v2873_v59 = vpop.eup %2247  ;;  %2267 = vtanh.f32 %v965_v55  ;;  %v2138_v5 = vpop.f32.mrb[22].mxu0  ;;  %768 = vadd.xlane.f32.xlu0 %v767_v53  ;;  %v980_v9 = vadd.f32 %v2106_v2, %v2769_v38  ;;  %v1311_v39 = vsel %vm724_vm1, %v1291_v48, 0.0  ;;  %v1003_v2 = vmul.f32 %v2864_v52, %v2784_v61 }
 0x13a   : > { %v2250_v6 = vpop.eup %2249  ;;  %2269 = vtanh.f32 %v1260_v58  ;;  %v974_v10 = vpop.f32.mrb[23].mxu1  ;;  %771 = vadd.xlane.f32.xlu1 %v770_v57  ;;  %v1270_v17 = vadd.f32 %v2138_v5, %v2769_v38  ;;  %v1314_v8 = vsel %vm724_vm1, %v1292_v4, 0.0 }
 0x13b   : > { %v1264_v11 = vpop.f32.mrb[23].mxu0  ;;  %v2252_v62 = vpop.eup %2251  ;;  %v1008_v12 = vmul.f32 %v2250_v6, %v2784_v61  ;;  %2271 = vtanh.f32 %v1255_v1  ;;  %v975_v13 = vadd.f32 %v2769_v38, %v974_v10  ;;  %v1027_v15 = vsel %vm724_vm1, %v1003_v2, 0.0 }
 0x13c   : > { %v2254_v14 = vpop.eup %2253  ;;  %v1007_v16 = vmul.f32 %v2252_v62, %v2784_v61  ;;  %2273 = vtanh.f32 %v980_v9  ;;  %v1265_v21 = vadd.f32 %v2769_v38, %v1264_v11  ;;  %v1024_v38 = vsel %vm724_vm1, %v1002_v33, 0.0 }
 0x13d   : > { %v2256_v18 = vpop.eup %2255  ;;  %v2891_v19 = vsel %vm724_vm1, %v1008_v12, 0.0  ;;  %v1298_v20 = vmul.f32 %v2254_v14, %v2784_v61  ;;  %2275 = vtanh.f32 %v975_v13  ;;  %1016 = vadd.xlane.f32.xlu0 %v1015_v3  ;;  %v1004_v9 = vmul.f32 %v2860_v47, %v2784_v61 }
 0x13e   : > { %v2258_v23 = vpop.eup %2257  ;;  %v2897_v22 = vsel %vm724_vm1, %v1007_v16, 0.0  ;;  %v1297_v25 = vmul.f32 %v2256_v18, %v2784_v61  ;;  %2277 = vtanh.f32 %v1270_v17  ;;  %1019 = vadd.xlane.f32.xlu1 %v1018_v7  ;;  %v1293_v47 = vmul.f32 %v2873_v59, %v2784_v61 }
 0x13f   : > { %v2260_v26 = vpop.eup %2259  ;;  %v2903_v28 = vsel %vm724_vm1, %v1298_v20, 0.0  ;;  %v1010_v29 = vmul.f32 %v2258_v23, %v2784_v61  ;;  %2279 = vtanh.f32 %v1265_v21  ;;  %v1030_v18 = vsel %vm724_vm1, %v1004_v9, 0.0 }
 0x140   : > { %v2262_v31 = vpop.eup %2261  ;;  %v2910_v35 = vsel %vm724_vm1, %v1297_v25, 0.0  ;;  %v1009_v36 = vmul.f32 %v2260_v26, %v2784_v61  ;;  %2281 = vtanh.f32 %v940_v60  ;;  %v1294_v20 = vmul.f32 %v2869_v56, %v2784_v61 }
 0x141   : > { %v2264_v37 = vpop.eup %2263  ;;  %v2916_v40 = vsel %vm724_vm1, %v1010_v29, 0.0  ;;  %v1300_v41 = vmul.f32 %v2262_v31, %v2784_v61  ;;  %1306 = vadd.xlane.f32.xlu0 %v1305_v24  ;;  %2283 = vtanh.f32 %v935_v0  ;;  %v1317_v24 = vsel %vm724_vm1, %v1293_v47, 0.0 }
 0x142   : > { %v2266_v42 = vpop.eup %2265  ;;  %v2922_v44 = vsel %vm724_vm1, %v1009_v36, 0.0  ;;  %v1299_v45 = vmul.f32 %v2264_v37, %v2784_v61  ;;  %1309 = vadd.xlane.f32.xlu1 %v1308_v32  ;;  %2285 = vtanh.f32 %v1230_v34  ;;  %v1320_v59 = vsel %vm724_vm1, %v1294_v20, 0.0 }
 0x143   : > { %v2268_v46 = vpop.eup %2267  ;;  %v2929_v49 = vsel %vm724_vm1, %v1300_v41, 0.0  ;;  %v1012_v50 = vmul.f32 %v2266_v42, %v2784_v61  ;;  %2287 = vtanh.f32 %v1225_v30 }
 0x144   : > { %v2270_v51 = vpop.eup %2269  ;;  %v1335_v53 = vsel %vm724_vm1, %v1299_v45, 0.0  ;;  %v1011_v54 = vmul.f32 %v2268_v46, %v2784_v61 }
 0x145   : > { %v2272_v55 = vpop.eup %2271  ;;  %v1054_v57 = vsel %vm724_vm1, %v1012_v50, 0.0  ;;  %v1302_v43 = vmul.f32 %v2270_v51, %v2784_v61  ;;  %1022 = vadd.xlane.f32.xlu0 %v1021_v63 }
 0x146   : > { %v2274_v58 = vpop.eup %2273  ;;  %v1051_v60 = vsel %vm724_vm1, %v1011_v54, 0.0  ;;  %v1301_v0 = vmul.f32 %v2272_v55, %v2784_v61  ;;  %1025 = vadd.xlane.f32.xlu1 %v1024_v38 }
 0x147   : > { %v2276_v1 = vpop.eup %2275  ;;  %v1344_v5 = vsel %vm724_vm1, %v1302_v43, 0.0  ;;  %v1014_v6 = vmul.f32 %v2274_v58, %v2784_v61 }
 0x148   : > { %v2278_v7 = vpop.eup %2277  ;;  %v1341_v10 = vsel %vm724_vm1, %v1301_v0, 0.0  ;;  %v1013_v11 = vmul.f32 %v2276_v1, %v2784_v61 }
 0x149   : > { %v2280_v62 = vpop.eup %2279  ;;  %v1060_v3 = vsel %vm724_vm1, %v1014_v6, 0.0  ;;  %v1304_v12 = vmul.f32 %v2278_v7, %v2784_v61  ;;  %1312 = vadd.xlane.f32.xlu0 %v1311_v39 }
 0x14a   : > { %v1057_v52 = vsel %vm724_vm1, %v1013_v11, 0.0  ;;  %v1303_v13 = vmul.f32 %v2280_v62, %v2784_v61  ;;  %v2282_v14 = vpop.eup %2281  ;;  %1315 = vadd.xlane.f32.xlu1 %v1314_v8 }
 0x14b   : > { %v1350_v16 = vsel %vm724_vm1, %v1304_v12, 0.0  ;;  %v2284_v17 = vpop.eup %2283  ;;  %v1006_v27 = vmul.f32 %v2282_v14, %v2784_v61 }
 0x14c   : > { %v1347_v21 = vsel %vm724_vm1, %v1303_v13, 0.0  ;;  %v2286_v23 = vpop.eup %2285  ;;  %v1005_v25 = vmul.f32 %v2284_v17, %v2784_v61 }
 0x14d   : > { %1028 = vadd.xlane.f32.xlu0 %v1027_v15  ;;  %v2288_v26 = vpop.eup %2287  ;;  %v1036_v31 = vsel %vm724_vm1, %v1006_v27, 0.0  ;;  %v1296_v32 = vmul.f32 %v2286_v23, %v2784_v61 }
 0x14e   : > { %1031 = vadd.xlane.f32.xlu1 %v1030_v18  ;;  %v1033_v29 = vsel %vm724_vm1, %v1005_v25, 0.0  ;;  %v1295_v56 = vmul.f32 %v2288_v26, %v2784_v61 }
 0x14f   : > { %v1326_v36 = vsel %vm724_vm1, %v1296_v32, 0.0 }
 0x150   : > { %v1323_v33 = vsel %vm724_vm1, %v1295_v56, 0.0 }
 0x151   : > { %1318 = vadd.xlane.f32.xlu0 %v1317_v24 }
 0x152   : > { %1321 = vadd.xlane.f32.xlu1 %v1320_v59 }
 0x155   : > { %1034 = vadd.xlane.f32.xlu0 %v1033_v29 }
 0x156   : > { %1037 = vadd.xlane.f32.xlu1 %v1036_v31 }
 0x159   : > { %1324 = vadd.xlane.f32.xlu0 %v1323_v33 }
 0x15a   : > { %1327 = vadd.xlane.f32.xlu1 %v1326_v36 }
 0x15d   : > { %1040 = vadd.xlane.f32.xlu0 %v2897_v22 }
 0x15e   : > { %1043 = vadd.xlane.f32.xlu1 %v2891_v19 }
 0x161   : > { %1330 = vadd.xlane.f32.xlu0 %v2910_v35 }
 0x162   : > { %1333 = vadd.xlane.f32.xlu1 %v2903_v28 }
 0x165   : > { %1046 = vadd.xlane.f32.xlu0 %v2922_v44 }
 0x166   : > { %1049 = vadd.xlane.f32.xlu1 %v2916_v40 }
 0x169   : > { %1336 = vadd.xlane.f32.xlu0 %v1335_v53 }
 0x16a   : > { %1339 = vadd.xlane.f32.xlu1 %v2929_v49 }
 0x16d   : > { %1052 = vadd.xlane.f32.xlu0 %v1051_v60 }
 0x16e   : > { %1055 = vadd.xlane.f32.xlu1 %v1054_v57 }
 0x171   : > { %1342 = vadd.xlane.f32.xlu0 %v1341_v10 }
 0x172   : > { %1345 = vadd.xlane.f32.xlu1 %v1344_v5 }
 0x175   : > { %1058 = vadd.xlane.f32.xlu0 %v1057_v52 }
 0x176   : > { %1061 = vadd.xlane.f32.xlu1 %v1060_v3 }
 0x179   : > { %1348 = vadd.xlane.f32.xlu0 %v1347_v21 }
 0x17a   : > { %1351 = vadd.xlane.f32.xlu1 %v1350_v16 }
 0x1aa   : > { %v730_v61 = vpop.xlane.xlu0 %729 }
 0x1ab   : > { %v2980_v19 = vpop.xlane.xlu1 %753 }
 0x1ae   : > { %v727_v22 = vpop.xlane.xlu0 %726 }
 0x1af   : > { %v736_v28 = vpop.xlane.xlu1 %735 }
 0x1b2   : > { %v2982_v35 = vpop.xlane.xlu0 %750 }
 0x1b3   : > { %v2984_v37 = vpop.xlane.xlu1 %759 }
 0x1b6   : > { %v2986_v34 = vpop.xlane.xlu0 %756 }
 0x1b7   : > { %v733_v40 = vpop.xlane.xlu1 %732 }
 0x1ba   : > { %v2988_v41 = vpop.xlane.xlu0 %738 }
 0x1bb   : > { %v2990_v42 = vpop.xlane.xlu1 %741 }
 0x1be   : > { %v2992_v30 = vpop.xlane.xlu0 %762 }
 0x1bf   : > { %v2994_v44 = vpop.xlane.xlu1 %765 }
 0x1c2   : > { %v2996_v45 = vpop.xlane.xlu0 %744 }
 0x1c3   : > { %v2998_v46 = vpop.xlane.xlu1 %747 }
 0x1c6   : > { %v3000_v63 = vpop.xlane.xlu0 %768 }
 0x1c7   : > { %v3002_v48 = vpop.xlane.xlu1 %771 }
 0x1ca   : > { %v1017_v49 = vpop.xlane.xlu0 %1016 }
 0x1cb   : > { %v1020_v50 = vpop.xlane.xlu1 %1019  ;;  %v1353_v51 = vmax.f32 %v727_v22, %v1017_v49 }
 0x1cc   : > { %v1354_v38 = vmax.f32 %v730_v61, %v1020_v50 }
 0x1ce   : > { %v1307_v4 = vpop.xlane.xlu0 %1306 }
 0x1cf   : > { %v1310_v53 = vpop.xlane.xlu1 %1309  ;;  %v1369_v54 = vmax.f32 %v1353_v51, %v1307_v4 }
 0x1d0   : > { %v1370_v55 = vmax.f32 %v1354_v38, %v1310_v53 }
 0x1d1   : > { %v1385_v57 = vsub.f32 %v727_v22, %v1369_v54  ;;  %v1433_v43 = vsub.f32 %v1017_v49, %v1369_v54  ;;  %v1481_v2 = vsub.f32 %v1307_v4, %v1369_v54 }
 0x1d2   : > { %v1386_v58 = vsub.f32 %v730_v61, %v1370_v55  ;;  %v1434_v60 = vsub.f32 %v1020_v50, %v1370_v55  ;;  %v1482_v0 = vsub.f32 %v1310_v53, %v1370_v55  ;;  %v1023_v1 = vpop.xlane.xlu0 %1022 }
 0x1d3   : > { %v1401_v39 = vmul.f32 1.442695, %v1385_v57  ;;  %v1026_v5 = vpop.xlane.xlu1 %1025  ;;  %v1449_v9 = vmul.f32 1.442695, %v1433_v43  ;;  %v1355_v10 = vmax.f32 %v733_v40, %v1023_v1  ;;  %v1497_v3 = vmul.f32 1.442695, %v1481_v2 }
 0x1d4   : > { %v1403_v6 = vmul.f32 1.442695, %v1386_v58  ;;  %v1451_v7 = vmul.f32 1.442695, %v1434_v60  ;;  %v1499_v8 = vmul.f32 1.442695, %v1482_v0  ;;  %v1356_v11 = vmax.f32 %v736_v28, %v1026_v5 }
 0x1d5   : > { %2289 = vpow2.f32 %v1401_v39 }
 0x1d6   : > { %2291 = vpow2.f32 %v1403_v6  ;;  %v1313_v62 = vpop.xlane.xlu0 %1312 }
 0x1d7   : > { %2293 = vpow2.f32 %v1451_v7  ;;  %v1316_v12 = vpop.xlane.xlu1 %1315  ;;  %v1371_v52 = vmax.f32 %v1355_v10, %v1313_v62 }
 0x1d8   : > { %2295 = vpow2.f32 %v1499_v8  ;;  %v1372_v13 = vmax.f32 %v1356_v11, %v1316_v12 }
 0x1d9   : > { %2297 = vpow2.f32 %v1449_v9  ;;  %v1387_v14 = vsub.f32 %v733_v40, %v1371_v52  ;;  %v1435_v15 = vsub.f32 %v1023_v1, %v1371_v52  ;;  %v1483_v21 = vsub.f32 %v1313_v62, %v1371_v52 }
 0x1da   : > { %v1388_v47 = vsub.f32 %v736_v28, %v1372_v13  ;;  %v1436_v16 = vsub.f32 %v1026_v5, %v1372_v13  ;;  %v1484_v17 = vsub.f32 %v1316_v12, %v1372_v13  ;;  %v1029_v18 = vpop.xlane.xlu0 %1028  ;;  %2299 = vpow2.f32 %v1497_v3 }
 0x1db   : > { %v1405_v20 = vmul.f32 1.442695, %v1387_v14  ;;  %v1032_v23 = vpop.xlane.xlu1 %1031  ;;  %v1453_v59 = vmul.f32 1.442695, %v1435_v15  ;;  %v1357_v27 = vmax.f32 %v2988_v41, %v1029_v18  ;;  %v1501_v32 = vmul.f32 1.442695, %v1483_v21 }
 0x1dc   : > { %v1407_v24 = vmul.f32 1.442695, %v1388_v47  ;;  %v1455_v25 = vmul.f32 1.442695, %v1436_v16  ;;  %v1503_v26 = vmul.f32 1.442695, %v1484_v17  ;;  %v1358_v29 = vmax.f32 %v2990_v42, %v1032_v23 }
 0x1dd   : > { %2301 = vpow2.f32 %v1405_v20 }
 0x1de   : > { %2303 = vpow2.f32 %v1407_v24  ;;  %v1319_v56 = vpop.xlane.xlu0 %1318 }
 0x1df   : > { %v3006_v31 = vpop.eup %2289  ;;  %2305 = vpow2.f32 %v1455_v25  ;;  %v1322_v33 = vpop.xlane.xlu1 %1321  ;;  %v1373_v36 = vmax.f32 %v1357_v27, %v1319_v56 }
 0x1e0   : > { %v3008_v61 = vpop.eup %2291  ;;  %2307 = vpow2.f32 %v1503_v26  ;;  %v1374_v22 = vmax.f32 %v1358_v29, %v1322_v33 }
 0x1e1   : > { %v3010_v28 = vpop.eup %2293  ;;  %2309 = vpow2.f32 %v1453_v59  ;;  %v1389_v40 = vsub.f32 %v2988_v41, %v1373_v36  ;;  %v1437_v57 = vsub.f32 %v1029_v18, %v1373_v36  ;;  %v1485_v0 = vsub.f32 %v1319_v56, %v1373_v36 }
 0x1e2   : > { %v3013_v49 = vpop.eup %2295  ;;  %v1530_v50 = vadd.f32 %v3010_v28, %v3008_v61  ;;  %v1390_v51 = vsub.f32 %v2990_v42, %v1374_v22  ;;  %v1438_v38 = vsub.f32 %v1032_v23, %v1374_v22  ;;  %v3018_v4 = vpop.xlane.xlu0 %1034  ;;  %2311 = vpow2.f32 %v1501_v32 }
 0x1e3   : > { %v3020_v53 = vpop.eup %2297  ;;  %v1486_v54 = vsub.f32 %v1322_v33, %v1374_v22  ;;  %v1409_v55 = vmul.f32 1.442695, %v1389_v40  ;;  %v1038_v43 = vpop.xlane.xlu1 %1037  ;;  %v1721_v42 = vlaneseq  ;;  %v1359_v2 = vmax.f32 %v2996_v45, %v3018_v4 }
 0x1e4   : > { %v1546_v41 = vadd.f32 %v3013_v49, %v1530_v50  ;;  %v1529_v58 = vadd.f32 %v3020_v53, %v3006_v31  ;;  %v1411_v60 = vmul.f32 1.442695, %v1390_v51  ;;  %v3025_v1 = vpop.eup %2299  ;;  %v1459_v39 = vmul.f32 1.442695, %v1438_v38 }
 0x1e5   : > { %2313 = vpow2.f32 %v1409_v55  ;;  %v1507_v6 = vmul.f32 1.442695, %v1486_v54  ;;  %v1360_v7 = vmax.f32 %v2998_v46, %v1038_v43  ;;  %v1457_v10 = vmul.f32 1.442695, %v1437_v57 }
 0x1e6   : > { %2315 = vrcp.f32 %v1546_v41  ;;  %v1545_v5 = vadd.f32 %v3025_v1, %v1529_v58  ;;  %v1325_v8 = vpop.xlane.xlu0 %1324  ;;  %v1505_v12 = vmul.f32 1.442695, %v1485_v0  ;;  %v3042_v14 = vand.u32 127, %v1721_v42 }
 0x1e7   : > { %v3035_v9 = vpop.eup %2301  ;;  %2317 = vpow2.f32 %v1411_v60  ;;  %v1328_v11 = vpop.xlane.xlu1 %1327  ;;  %v1375_v62 = vmax.f32 %v1359_v2, %v1325_v8 }
 0x1e8   : > { %v3037_v3 = vpop.eup %2303  ;;  %2319 = vrcp.f32 %v1545_v5  ;;  %v1376_v52 = vmax.f32 %v1360_v7, %v1328_v11  ;;  %vm1723_vm3 = vcmp.eq.s32.totalorder %v3042_v14, 0  ;;  %vm1740_vm4 = vcmp.eq.s32.totalorder %v3042_v14, 1 }
 0x1e9   : > { %v3040_v13 = vpop.eup %2305  ;;  %2321 = vpow2.f32 %v1459_v39  ;;  %v1391_v15 = vsub.f32 %v2996_v45, %v1375_v62  ;;  %v1439_v47 = vsub.f32 %v3018_v4, %v1375_v62  ;;  %v1487_v45 = vsub.f32 %v1325_v8, %v1375_v62 }
 0x1ea   : > { %v3046_v16 = vpop.eup %2307  ;;  %v1532_v17 = vadd.f32 %v3040_v13, %v3037_v3  ;;  %2323 = vpow2.f32 %v1507_v6  ;;  %v1392_v18 = vsub.f32 %v2998_v46, %v1376_v52  ;;  %v1440_v20 = vsub.f32 %v1038_v43, %v1376_v52  ;;  %v3051_v21 = vpop.xlane.xlu0 %1040 }
 0x1eb   : > { %v3053_v23 = vpop.eup %2309  ;;  %2325 = vpow2.f32 %v1457_v10  ;;  %v1488_v24 = vsub.f32 %v1328_v11, %v1376_v52  ;;  %v1413_v25 = vmul.f32 1.442695, %v1391_v15  ;;  %v3055_v26 = vpop.xlane.xlu1 %1043  ;;  %v1361_v22 = vmax.f32 %v2982_v35, %v3051_v21 }
 0x1ec   : > { %v1548_v59 = vadd.f32 %v3046_v16, %v1532_v17  ;;  %v1531_v46 = vadd.f32 %v3053_v23, %v3035_v9  ;;  %2327 = vpow2.f32 %v1505_v12  ;;  %v1415_v27 = vmul.f32 1.442695, %v1392_v18  ;;  %v3065_v29 = vpop.eup %2311 }
 0x1ed   : > { %v1463_v56 = vmul.f32 1.442695, %v1440_v20  ;;  %v1511_v32 = vmul.f32 1.442695, %v1488_v24  ;;  %2329 = vpow2.f32 %v1413_v25  ;;  %v1362_v36 = vmax.f32 %v2980_v19, %v3055_v26  ;;  %v2422_v25 = vld [vmem:[%s2668_s23 + $0x100] sm:$0xff] }
 0x1ee   : > { %2331 = vrcp.f32 %v1548_v59  ;;  %v1547_v33 = vadd.f32 %v3065_v29, %v1531_v46  ;;  %v3073_v40 = vpop.xlane.xlu0 %1330  ;;  %vm1757_vm5 = vcmp.eq.s32.totalorder %v3042_v14, 2  ;;  %v1461_v51 = vmul.f32 1.442695, %v1439_v47 }
 0x1ef   : > { %v3075_v50 = vpop.eup %2313  ;;  %2333 = vpow2.f32 %v1415_v27  ;;  %v3079_v38 = vpop.xlane.xlu1 %1333  ;;  %v1509_v54 = vmul.f32 1.442695, %v1487_v45  ;;  %v3086_v57 = vmax.f32 %v1361_v22, %v3073_v40 }
 0x1f0   : > { %v2316_v4 = vpop.eup %2315  ;;  %2335 = vrcp.f32 %v1547_v33  ;;  %v3083_v55 = vmax.f32 %v1362_v36, %v3079_v38 }
 0x1f1   : > { %v3088_v43 = vpop.eup %2317  ;;  %v1578_v41 = vmul.f32 %v2316_v4, %v3008_v61  ;;  %v1594_v58 = vmul.f32 %v2316_v4, %v3010_v28  ;;  %v1610_v60 = vmul.f32 %v2316_v4, %v3013_v49  ;;  %2337 = vpow2.f32 %v1463_v56  ;;  %v2417_v61 = vld [vmem:[%s2668_s23 + $0x8] sm:$0xff] }
 0x1f2   : > { %v2320_v0 = vpop.eup %2319  ;;  %2339 = vpow2.f32 %v1511_v32  ;;  %v1394_v42 = vsub.f32 %v2980_v19, %v3083_v55  ;;  %v1442_v39 = vsub.f32 %v3055_v26, %v3083_v55  ;;  %v1490_v2 = vsub.f32 %v3079_v38, %v3083_v55  ;;  %v2418_v49 = vld [vmem:[%s2668_s23 + $0x88] sm:$0xff]  ;;  %v3144_v46 = vpop.xlane.xlu0 %1046 }
 0x1f3   : > { %v3099_v5 = vpop.eup %2321  ;;  %v1626_v28 = vmul.f32 %v2417_v61, %v1578_v41  ;;  %v1642_v6 = vmul.f32 %v2418_v49, %v1594_v58  ;;  %v2419_v19 = vld [vmem:[%s2668_s23 + $0x108] sm:$0xff]  ;;  %v1725_v8 = vsel %vm1723_vm3, %v1578_v41, 0.0  ;;  %v1577_v62 = vmul.f32 %v2320_v0, %v3006_v31  ;;  %v2420_v31 = vld [vmem:[%s2668_s23] sm:$0xff]  ;;  %v3142_v59 = vpop.xlane.xlu1 %1049 }
 0x1f4   : > { %v1674_v7 = vmul.f32 %v2419_v19, %v1610_v60  ;;  %v3113_v10 = vpop.eup %2323  ;;  %v1742_v11 = vsel %vm1740_vm4, %v1594_v58, %v1725_v8  ;;  %v1593_v12 = vmul.f32 %v2320_v0, %v3020_v53  ;;  %v1609_v52 = vmul.f32 %v2320_v0, %v3025_v1  ;;  %v2421_v1 = vld [vmem:[%s2668_s23 + $0x80] sm:$0xff]  ;;  %v2423_v19 = vld [vmem:[%s2668_s23 + $0x18] sm:$0xff] }
 0x1f5   : > { %v3120_v15 = vpop.eup %2325  ;;  %v1658_v47 = vadd.f32 %v1642_v6, %v1626_v28  ;;  %v1759_v17 = vsel %vm1757_vm5, %v1610_v60, %v1742_v11  ;;  %v1534_v18 = vadd.f32 %v3099_v5, %v3088_v43  ;;  %2341 = vpow2.f32 %v1461_v51  ;;  %v2424_v8 = vld [vmem:[%s2668_s23 + $0x98] sm:$0xff] }
 0x1f6   : > { %v3126_v20 = vpop.eup %2327  ;;  %1776 = vst.msk [vmem:[%s3106_s30 + $0x8] sm:$0xff] %vm1774_vm2, %v1759_v17  ;;  %v1625_v53 = vmul.f32 %v2420_v31, %v1577_v62  ;;  %v1641_v24 = vmul.f32 %v2421_v1, %v1593_v12  ;;  %v1673_v45 = vmul.f32 %v2422_v25, %v1609_v52  ;;  %v1724_v26 = vsel %vm1723_vm3, %v1577_v62, 0.0  ;;  %v2428_v25 = vld [vmem:[%s2668_s23 + $0x110] sm:$0xff] }
 0x1f7   : > { %v3146_v27 = vpop.eup %2329  ;;  %v1690_v56 = vadd.f32 %v1674_v7, %v1658_v47  ;;  %v1741_v32 = vsel %vm1740_vm4, %v1593_v12, %v1724_v26  ;;  %v1550_v33 = vadd.f32 %v3113_v10, %v1534_v18  ;;  %v1533_v36 = vadd.f32 %v3120_v15, %v3075_v50  ;;  %v3181_v17 = vpop.xlane.xlu1 %1339 }
 0x1f8   : > { %v2332_v22 = vpop.eup %2331  ;;  %v1657_v51 = vadd.f32 %v1641_v24, %v1625_v53  ;;  %v1758_v4 = vsel %vm1757_vm5, %v1609_v52, %v1741_v32  ;;  %2343 = vpow2.f32 %v1509_v54  ;;  %v1419_v41 = vmul.f32 1.442695, %v1394_v42  ;;  %v3183_v18 = vpop.xlane.xlu0 %1336  ;;  %v2426_v24 = vld [vmem:[%s2668_s23 + $0x10] sm:$0xff] }
 0x1f9   : > { %v3155_v58 = vpop.eup %2333  ;;  %1706 = vst.msk [vmem:[%s3133_s8 + $0x8] sm:$0xff] %vm498_vm0, %v1690_v56  ;;  %v1580_v60 = vmul.f32 %v2332_v22, %v3037_v3  ;;  %v1596_v0 = vmul.f32 %v2332_v22, %v3040_v13  ;;  %v1612_v61 = vmul.f32 %v2332_v22, %v3046_v16  ;;  %2345 = vrcp.f32 %v1550_v33  ;;  %v2425_v3 = vld [vmem:[%s2668_s23 + $0x118] sm:$0xff] }
 0x1fa   : > { %1775 = vst.msk [vmem:[%s3106_s30] sm:$0xff] %vm1774_vm2, %v1758_v4  ;;  %v2336_v28 = vpop.eup %2335  ;;  %v1689_v49 = vadd.f32 %v1673_v45, %v1657_v51  ;;  %v1549_v54 = vadd.f32 %v3126_v20, %v1533_v36  ;;  %2347 = vpow2.f32 %v1419_v41  ;;  %v1467_v42 = vmul.f32 1.442695, %v1442_v39 }
 0x1fb   : > { %v3165_v6 = vpop.eup %2337  ;;  %v1628_v7 = vmul.f32 %v2423_v19, %v1580_v60  ;;  %v1644_v11 = vmul.f32 %v2424_v8, %v1596_v0  ;;  %v1676_v13 = vmul.f32 %v2425_v3, %v1612_v61  ;;  %v1727_v16 = vsel %vm1723_vm3, %v1580_v60, 0.0 }
 0x1fc   : > { %v3172_v62 = vpop.eup %2339  ;;  %1705 = vst.msk [vmem:[%s3133_s8] sm:$0xff] %vm498_vm0, %v1689_v49  ;;  %v1744_v39 = vsel %vm1740_vm4, %v1596_v0, %v1727_v16  ;;  %v1579_v12 = vmul.f32 %v2336_v28, %v3035_v9  ;;  %v1595_v52 = vmul.f32 %v2336_v28, %v3053_v23  ;;  %v1611_v47 = vmul.f32 %v2336_v28, %v3065_v29  ;;  %v2427_v23 = vld [vmem:[%s2668_s23 + $0x90] sm:$0xff] }
 0x1fd   : > { %v1660_v31 = vadd.f32 %v1644_v11, %v1628_v7  ;;  %v1761_v53 = vsel %vm1757_vm5, %v1612_v61, %v1744_v39  ;;  %2349 = vrcp.f32 %v1549_v54  ;;  %v1536_v1 = vadd.f32 %v3165_v6, %v3155_v58 }
 0x1fe   : > { %1778 = vst.msk [vmem:[%s3106_s30 + $0x18] sm:$0xff] %vm1774_vm2, %v1761_v53  ;;  %v1627_v9 = vmul.f32 %v2426_v24, %v1579_v12  ;;  %v1643_v29 = vmul.f32 %v2427_v23, %v1595_v52  ;;  %v1675_v45 = vmul.f32 %v2428_v25, %v1611_v47  ;;  %v1726_v26 = vsel %vm1723_vm3, %v1579_v12, 0.0  ;;  %v2429_v12 = vld [vmem:[%s2668_s23 + $0x28] sm:$0xff] }
 0x1ff   : > { %v3196_v56 = vpop.eup %2341  ;;  %v1692_v32 = vadd.f32 %v1676_v13, %v1660_v31  ;;  %v1743_v33 = vsel %vm1740_vm4, %v1595_v52, %v1726_v26  ;;  %v1552_v36 = vadd.f32 %v3172_v62, %v1536_v1  ;;  %2351 = vpow2.f32 %v1467_v42 }
 0x200   : > { %v1659_v22 = vadd.f32 %v1643_v29, %v1627_v9  ;;  %v1760_v51 = vsel %vm1757_vm5, %v1611_v47, %v1743_v33  ;;  %v1535_v4 = vadd.f32 %v3196_v56, %v3146_v27  ;;  %v1515_v41 = vmul.f32 1.442695, %v1490_v2  ;;  %v3224_v2 = vpop.xlane.xlu1 %1055 }
 0x201   : > { %1708 = vst.msk [vmem:[%s3133_s8 + $0x18] sm:$0xff] %vm498_vm0, %v1692_v32  ;;  %2353 = vrcp.f32 %v1552_v36  ;;  %v1393_v60 = vsub.f32 %v2982_v35, %v3086_v57  ;;  %v1441_v0 = vsub.f32 %v3051_v21, %v3086_v57  ;;  %v1489_v61 = vsub.f32 %v3073_v40, %v3086_v57  ;;  %v3226_v35 = vpop.xlane.xlu0 %1052  ;;  %v2432_v36 = vld [vmem:[%s2668_s23 + $0x20] sm:$0xff] }
 0x202   : > { %1777 = vst.msk [vmem:[%s3106_s30 + $0x10] sm:$0xff] %vm1774_vm2, %v1760_v51  ;;  %v3218_v28 = vpop.eup %2343  ;;  %v1691_v49 = vadd.f32 %v1675_v45, %v1659_v22  ;;  %2355 = vpow2.f32 %v1515_v41  ;;  %v1364_v38 = vmax.f32 %v2984_v37, %v3142_v59  ;;  %v1363_v55 = vmax.f32 %v2986_v34, %v3144_v46  ;;  %v2433_v51 = vld [vmem:[%s2668_s23 + $0xa0] sm:$0xff] }
 0x203   : > { %v2346_v54 = vpop.eup %2345  ;;  %v1551_v21 = vadd.f32 %v3218_v28, %v1535_v4  ;;  %v1417_v40 = vmul.f32 1.442695, %v1393_v60  ;;  %v1465_v57 = vmul.f32 1.442695, %v1441_v0  ;;  %v1513_v42 = vmul.f32 1.442695, %v1489_v61 }
 0x204   : > { %v3229_v19 = vpop.eup %2347  ;;  %1707 = vst.msk [vmem:[%s3133_s8 + $0x10] sm:$0xff] %vm498_vm0, %v1691_v49  ;;  %v1582_v7 = vmul.f32 %v2346_v54, %v3088_v43  ;;  %v1598_v8 = vmul.f32 %v2346_v54, %v3099_v5  ;;  %v1614_v11 = vmul.f32 %v2346_v54, %v3113_v10  ;;  %v1380_v3 = vmax.f32 %v1364_v38, %v3181_v17  ;;  %v2430_v43 = vld [vmem:[%s2668_s23 + $0xa8] sm:$0xff]  ;;  %v2434_v41 = vld [vmem:[%s2668_s23 + $0x120] sm:$0xff] }
 0x205   : > { %2357 = vrcp.f32 %v1551_v21  ;;  %v3238_v13 = vmax.f32 %v1363_v55, %v3183_v18  ;;  %v1366_v16 = vmax.f32 %v2994_v44, %v3224_v2  ;;  %v1365_v39 = vmax.f32 %v2992_v30, %v3226_v35  ;;  %v2431_v5 = vld [vmem:[%s2668_s23 + $0x128] sm:$0xff] }
 0x206   : > { %v1630_v52 = vmul.f32 %v2429_v12, %v1582_v7  ;;  %v1646_v47 = vmul.f32 %v2430_v43, %v1598_v8  ;;  %v1678_v31 = vmul.f32 %v2431_v5, %v1614_v11  ;;  %v1729_v10 = vsel %vm1723_vm3, %v1582_v7, 0.0  ;;  %v2436_v12 = vld [vmem:[%s2668_s23 + $0xb8] sm:$0xff] }
 0x207   : > { %v2350_v53 = vpop.eup %2349  ;;  %v1746_v1 = vsel %vm1740_vm4, %v1598_v8, %v1729_v10  ;;  %2359 = vpow2.f32 %v1417_v40  ;;  %v1396_v24 = vsub.f32 %v2984_v37, %v1380_v3  ;;  %v1444_v9 = vsub.f32 %v3142_v59, %v1380_v3  ;;  %v2435_v8 = vld [vmem:[%s2668_s23 + $0x38] sm:$0xff] }
 0x208   : > { %v1662_v23 = vadd.f32 %v1646_v47, %v1630_v52  ;;  %v1763_v29 = vsel %vm1757_vm5, %v1614_v11, %v1746_v1  ;;  %v1581_v25 = vmul.f32 %v2350_v53, %v3075_v50  ;;  %v1597_v45 = vmul.f32 %v2350_v53, %v3120_v15  ;;  %v2437_v43 = vld [vmem:[%s2668_s23 + $0x138] sm:$0xff] }
 0x209   : > { %v3257_v26 = vpop.eup %2351  ;;  %1780 = vst.msk [vmem:[%s3106_s30 + $0x28] sm:$0xff] %vm1774_vm2, %v1763_v29  ;;  %v1613_v32 = vmul.f32 %v2350_v53, %v3126_v20  ;;  %2361 = vpow2.f32 %v1465_v57  ;;  %v1423_v37 = vmul.f32 1.442695, %v1396_v24  ;;  %v1471_v33 = vmul.f32 1.442695, %v1444_v9 }
 0x20a   : > { %v1694_v59 = vadd.f32 %v1678_v31, %v1662_v23  ;;  %v1629_v22 = vmul.f32 %v2432_v36, %v1581_v25  ;;  %v1645_v4 = vmul.f32 %v2433_v51, %v1597_v45  ;;  %v1728_v50 = vsel %vm1723_vm3, %v1581_v25, 0.0  ;;  %v2438_v25 = vld [vmem:[%s2668_s23 + $0x30] sm:$0xff] }
 0x20b   : > { %v2354_v15 = vpop.eup %2353  ;;  %v1677_v60 = vmul.f32 %v2434_v41, %v1613_v32  ;;  %v1745_v0 = vsel %vm1740_vm4, %v1597_v45, %v1728_v50  ;;  %v1538_v20 = vadd.f32 %v3257_v26, %v3229_v19  ;;  %2363 = vpow2.f32 %v1513_v42  ;;  %v3284_v42 = vpop.xlane.xlu1 %1345 }
 0x20c   : > { %v3271_v61 = vpop.eup %2355  ;;  %1710 = vst.msk [vmem:[%s3133_s8 + $0x28] sm:$0xff] %vm498_vm0, %v1694_v59  ;;  %v1661_v49 = vadd.f32 %v1645_v4, %v1629_v22  ;;  %v1762_v38 = vsel %vm1757_vm5, %v1613_v32, %v1745_v0  ;;  %v1584_v55 = vmul.f32 %v2354_v15, %v3155_v58  ;;  %v1600_v54 = vmul.f32 %v2354_v15, %v3165_v6 }
 0x20d   : > { %1779 = vst.msk [vmem:[%s3106_s30 + $0x20] sm:$0xff] %vm1774_vm2, %v1762_v38  ;;  %v1616_v21 = vmul.f32 %v2354_v15, %v3172_v62  ;;  %v1554_v40 = vadd.f32 %v3271_v61, %v1538_v20  ;;  %2365 = vpow2.f32 %v1423_v37  ;;  %v1492_v57 = vsub.f32 %v3181_v17, %v1380_v3  ;;  %v3293_v3 = vpop.xlane.xlu0 %1342 }
 0x20e   : > { %v1693_v7 = vadd.f32 %v1677_v60, %v1661_v49  ;;  %v1632_v11 = vmul.f32 %v2435_v8, %v1584_v55  ;;  %v1648_v58 = vmul.f32 %v2436_v12, %v1600_v54  ;;  %v1731_v6 = vsel %vm1723_vm3, %v1584_v55, 0.0 }
 0x20f   : > { %v2358_v52 = vpop.eup %2357  ;;  %v1680_v62 = vmul.f32 %v2437_v43, %v1616_v21  ;;  %v1748_v47 = vsel %vm1740_vm4, %v1600_v54, %v1731_v6  ;;  %2367 = vrcp.f32 %v1554_v40  ;;  %v1519_v17 = vmul.f32 1.442695, %v1492_v57  ;;  %v3319_v36 = vpop.xlane.xlu1 %1061 }
 0x210   : > { %1709 = vst.msk [vmem:[%s3133_s8 + $0x20] sm:$0xff] %vm498_vm0, %v1693_v7  ;;  %v1664_v5 = vadd.f32 %v1648_v58, %v1632_v11  ;;  %v1765_v31 = vsel %vm1757_vm5, %v1616_v21, %v1748_v47  ;;  %v1583_v10 = vmul.f32 %v2358_v52, %v3146_v27  ;;  %v1599_v53 = vmul.f32 %v2358_v52, %v3196_v56  ;;  %v2439_v27 = vld [vmem:[%s2668_s23 + $0xb0] sm:$0xff] }
 0x211   : > { %v3301_v1 = vpop.eup %2359  ;;  %1782 = vst.msk [vmem:[%s3106_s30 + $0x38] sm:$0xff] %vm1774_vm2, %v1765_v31  ;;  %v1615_v24 = vmul.f32 %v2358_v52, %v3218_v28  ;;  %2369 = vpow2.f32 %v1471_v33  ;;  %v1395_v9 = vsub.f32 %v2986_v34, %v3238_v13  ;;  %v1443_v23 = vsub.f32 %v3144_v46, %v3238_v13  ;;  %v2440_v28 = vld [vmem:[%s2668_s23 + $0x130] sm:$0xff]  ;;  %v3341_v0 = vpop.xlane.xlu0 %1058 }
 0x212   : > { %v1696_v29 = vadd.f32 %v1680_v62, %v1664_v5  ;;  %v1631_v45 = vmul.f32 %v2438_v25, %v1583_v10  ;;  %v1647_v56 = vmul.f32 %v2439_v27, %v1599_v53  ;;  %v1730_v32 = vsel %vm1723_vm3, %v1583_v10, 0.0  ;;  %v2441_v62 = vld [vmem:[%s2668_s23 + $0x48] sm:$0xff] }
 0x213   : > { %v3314_v37 = vpop.eup %2361  ;;  %v1679_v33 = vmul.f32 %v2440_v28, %v1615_v24  ;;  %v1747_v59 = vsel %vm1740_vm4, %v1599_v53, %v1730_v32  ;;  %2371 = vpow2.f32 %v1519_v17  ;;  %v1421_v34 = vmul.f32 1.442695, %v1395_v9  ;;  %v2442_v17 = vld [vmem:[%s2668_s23 + $0xc8] sm:$0xff] }
 0x214   : > { %1712 = vst.msk [vmem:[%s3133_s8 + $0x38] sm:$0xff] %vm498_vm0, %v1696_v29  ;;  %v1663_v46 = vadd.f32 %v1647_v56, %v1631_v45  ;;  %v1764_v22 = vsel %vm1757_vm5, %v1615_v24, %v1747_v59  ;;  %v1537_v51 = vadd.f32 %v3314_v37, %v3301_v1  ;;  %v1469_v4 = vmul.f32 1.442695, %v1443_v23 }
 0x215   : > { %v3327_v50 = vpop.eup %2363  ;;  %1781 = vst.msk [vmem:[%s3106_s30 + $0x30] sm:$0xff] %vm1774_vm2, %v1764_v22  ;;  %2373 = vpow2.f32 %v1421_v34  ;;  %v1491_v15 = vsub.f32 %v3183_v18, %v3238_v13  ;;  %v1382_v41 = vmax.f32 %v1366_v16, %v3284_v42  ;;  %v1381_v60 = vmax.f32 %v1365_v39, %v3293_v3  ;;  %v1349_v43 = vpop.xlane.xlu0 %1348 }
 0x216   : > { %v1695_v20 = vadd.f32 %v1679_v33, %v1663_v46  ;;  %v1553_v49 = vadd.f32 %v3327_v50, %v1537_v51  ;;  %2375 = vpow2.f32 %v1469_v4  ;;  %v1368_v38 = vmax.f32 %v3002_v48, %v3319_v36 }
 0x217   : > { %v3346_v18 = vpop.eup %2365  ;;  %v1517_v13 = vmul.f32 1.442695, %v1491_v15  ;;  %v1398_v55 = vsub.f32 %v2994_v44, %v1382_v41  ;;  %v1446_v16 = vsub.f32 %v3224_v2, %v1382_v41  ;;  %v1494_v54 = vsub.f32 %v3284_v42, %v1382_v41 }
 0x218   : > { %1711 = vst.msk [vmem:[%s3133_s8 + $0x30] sm:$0xff] %vm498_vm0, %v1695_v20  ;;  %2377 = vrcp.f32 %v1553_v49  ;;  %v1397_v39 = vsub.f32 %v2992_v30, %v1381_v60  ;;  %v1445_v21 = vsub.f32 %v3226_v35, %v1381_v60  ;;  %v1493_v40 = vsub.f32 %v3293_v3, %v1381_v60  ;;  %v1352_v30 = vpop.xlane.xlu1 %1351  ;;  %v2443_v3 = vld [vmem:[%s2668_s23 + $0x148] sm:$0xff] }
 0x219   : > { %v2368_v57 = vpop.eup %2367  ;;  %2379 = vpow2.f32 %v1517_v13  ;;  %v1427_v7 = vmul.f32 1.442695, %v1398_v55  ;;  %v1475_v8 = vmul.f32 1.442695, %v1446_v16  ;;  %v1523_v44 = vmul.f32 1.442695, %v1494_v54 }
 0x21a   : > { %v1586_v2 = vmul.f32 %v2368_v57, %v3229_v19  ;;  %v1602_v42 = vmul.f32 %v2368_v57, %v3257_v26  ;;  %v1618_v11 = vmul.f32 %v2368_v57, %v3271_v61  ;;  %v1425_v12 = vmul.f32 1.442695, %v1397_v39  ;;  %v2445_v13 = vld [vmem:[%s2668_s23 + $0xc0] sm:$0xff] }
 0x21b   : > { %v3359_v58 = vpop.eup %2369  ;;  %2381 = vpow2.f32 %v1427_v7  ;;  %v1473_v35 = vmul.f32 1.442695, %v1445_v21  ;;  %v1521_v6 = vmul.f32 1.442695, %v1493_v40  ;;  %v1367_v52 = vmax.f32 %v3000_v63, %v3341_v0 }
 0x21c   : > { %v1634_v47 = vmul.f32 %v2441_v62, %v1586_v2  ;;  %v1650_v19 = vmul.f32 %v2442_v17, %v1602_v42  ;;  %v1682_v26 = vmul.f32 %v2443_v3, %v1618_v11  ;;  %v1733_v61 = vsel %vm1723_vm3, %v1586_v2, 0.0 }
 0x21d   : > { %v3368_v5 = vpop.eup %2371  ;;  %v1750_v31 = vsel %vm1740_vm4, %v1602_v42, %v1733_v61  ;;  %v1540_v10 = vadd.f32 %v3359_v58, %v3346_v18  ;;  %2383 = vpow2.f32 %v1475_v8  ;;  %v1384_v53 = vmax.f32 %v1368_v38, %v1352_v30  ;;  %v2444_v38 = vld [vmem:[%s2668_s23 + $0x40] sm:$0xff] }
 0x21e   : > { %v1666_v24 = vadd.f32 %v1650_v19, %v1634_v47  ;;  %v1767_v9 = vsel %vm1757_vm5, %v1618_v11, %v1750_v31  ;;  %2385 = vpow2.f32 %v1523_v44  ;;  %v1383_v23 = vmax.f32 %v1367_v52, %v1349_v43  ;;  %v2447_v19 = vld [vmem:[%s2668_s23 + $0x58] sm:$0xff] }
 0x21f   : > { %v3376_v29 = vpop.eup %2373  ;;  %1784 = vst.msk [vmem:[%s3106_s30 + $0x48] sm:$0xff] %vm1774_vm2, %v1767_v9  ;;  %v1556_v25 = vadd.f32 %v3368_v5, %v1540_v10  ;;  %2387 = vpow2.f32 %v1425_v12  ;;  %v1400_v45 = vsub.f32 %v3002_v48, %v1384_v53  ;;  %v1448_v27 = vsub.f32 %v3319_v36, %v1384_v53 }
 0x220   : > { %v3383_v56 = vpop.eup %2375  ;;  %v1698_v32 = vadd.f32 %v1682_v26, %v1666_v24  ;;  %2389 = vpow2.f32 %v1473_v35  ;;  %v1496_v28 = vsub.f32 %v1352_v30, %v1384_v53  ;;  %v1399_v33 = vsub.f32 %v3000_v63, %v1383_v23  ;;  %v2448_v26 = vld [vmem:[%s2668_s23 + $0xd8] sm:$0xff] }
 0x221   : > { %2391 = vrcp.f32 %v1556_v25  ;;  %v1539_v59 = vadd.f32 %v3383_v56, %v3376_v29  ;;  %v1431_v34 = vmul.f32 1.442695, %v1400_v45  ;;  %v1479_v46 = vmul.f32 1.442695, %v1448_v27  ;;  %v2449_v53 = vld [vmem:[%s2668_s23 + $0x158] sm:$0xff] }
 0x222   : > { %v2378_v22 = vpop.eup %2377  ;;  %1714 = vst.msk [vmem:[%s3133_s8 + $0x48] sm:$0xff] %vm498_vm0, %v1698_v32  ;;  %2393 = vpow2.f32 %v1521_v6  ;;  %v1527_v48 = vmul.f32 1.442695, %v1496_v28  ;;  %v1447_v36 = vsub.f32 %v3341_v0, %v1383_v23  ;;  %v1429_v60 = vmul.f32 1.442695, %v1399_v33 }
 0x223   : > { %v3391_v51 = vpop.eup %2379  ;;  %v1585_v63 = vmul.f32 %v2378_v22, %v3301_v1  ;;  %v1601_v4 = vmul.f32 %v2378_v22, %v3314_v37  ;;  %v1617_v15 = vmul.f32 %v2378_v22, %v3327_v50  ;;  %2395 = vpow2.f32 %v1431_v34  ;;  %v2446_v37 = vld [vmem:[%s2668_s23 + $0x140] sm:$0xff]  ;;  %v2450_v34 = vld [vmem:[%s2668_s23 + $0x50] sm:$0xff] }
 0x224   : > { %v1555_v41 = vadd.f32 %v3391_v51, %v1539_v59  ;;  %2397 = vpow2.f32 %v1479_v46  ;;  %v1495_v20 = vsub.f32 %v1349_v43, %v1383_v23  ;;  %v1477_v16 = vmul.f32 1.442695, %v1447_v36  ;;  %v2451_v22 = vld [vmem:[%s2668_s23 + $0xd0] sm:$0xff] }
 0x225   : > { %v3397_v49 = vpop.eup %2381  ;;  %v1633_v0 = vmul.f32 %v2444_v38, %v1585_v63  ;;  %v1649_v55 = vmul.f32 %v2445_v13, %v1601_v4  ;;  %v1732_v1 = vsel %vm1723_vm3, %v1585_v63, 0.0  ;;  %v1681_v54 = vmul.f32 %v2446_v37, %v1617_v15 }
 0x226   : > { %v1749_v50 = vsel %vm1740_vm4, %v1601_v4, %v1732_v1  ;;  %2399 = vrcp.f32 %v1555_v41  ;;  %v1525_v57 = vmul.f32 1.442695, %v1495_v20  ;;  %v2452_v4 = vld [vmem:[%s2668_s23 + $0x150] sm:$0xff] }
 0x227   : > { %v3406_v39 = vpop.eup %2383  ;;  %v1665_v21 = vadd.f32 %v1649_v55, %v1633_v0  ;;  %v1766_v40 = vsel %vm1757_vm5, %v1617_v15, %v1749_v50  ;;  %2401 = vpow2.f32 %v1527_v48 }
 0x228   : > { %v3410_v7 = vpop.eup %2385  ;;  %1783 = vst.msk [vmem:[%s3106_s30 + $0x40] sm:$0xff] %vm1774_vm2, %v1766_v40  ;;  %v1542_v8 = vadd.f32 %v3406_v39, %v3397_v49  ;;  %2403 = vpow2.f32 %v1429_v60 }
 0x229   : > { %v3416_v44 = vpop.eup %2387  ;;  %v1697_v2 = vadd.f32 %v1681_v54, %v1665_v21  ;;  %2405 = vpow2.f32 %v1477_v16  ;;  %v2453_v16 = vld [vmem:[%s2668_s23 + $0x68] sm:$0xff] }
 0x22a   : > { %v3418_v42 = vpop.eup %2389  ;;  %v1558_v11 = vadd.f32 %v3410_v7, %v1542_v8  ;;  %2407 = vpow2.f32 %v1525_v57  ;;  %v2454_v54 = vld [vmem:[%s2668_s23 + $0xe8] sm:$0xff] }
 0x22b   : > { %v2392_v12 = vpop.eup %2391  ;;  %1713 = vst.msk [vmem:[%s3133_s8 + $0x40] sm:$0xff] %vm498_vm0, %v1697_v2  ;;  %v1541_v30 = vadd.f32 %v3418_v42, %v3416_v44  ;;  %v2455_v8 = vld [vmem:[%s2668_s23 + $0x168] sm:$0xff] }
 0x22c   : > { %v2394_v35 = vpop.eup %2393  ;;  %v1588_v6 = vmul.f32 %v2392_v12, %v3346_v18  ;;  %v1604_v52 = vmul.f32 %v2392_v12, %v3359_v58  ;;  %v1620_v43 = vmul.f32 %v2392_v12, %v3368_v5  ;;  %2409 = vrcp.f32 %v1558_v11  ;;  %v2456_v12 = vld [vmem:[%s2668_s23 + $0x60] sm:$0xff] }
 0x22d   : > { %v3428_v62 = vpop.eup %2395  ;;  %v1557_v47 = vadd.f32 %v2394_v35, %v1541_v30 }
 0x22e   : > { %v3430_v17 = vpop.eup %2397  ;;  %v1636_v3 = vmul.f32 %v2447_v19, %v1588_v6  ;;  %v1652_v61 = vmul.f32 %v2448_v26, %v1604_v52  ;;  %v1735_v31 = vsel %vm1723_vm3, %v1588_v6, 0.0  ;;  %v1684_v24 = vmul.f32 %v2449_v53, %v1620_v43  ;;  %v2457_v6 = vld [vmem:[%s2668_s23 + $0xe0] sm:$0xff]  ;;  %v2460_v53 = vld [vmem:[%s2668_s23 + $0xf8] sm:$0xff] }
 0x22f   : > { %v1752_v18 = vsel %vm1740_vm4, %v1604_v52, %v1735_v31  ;;  %2411 = vrcp.f32 %v1557_v47  ;;  %v1544_v58 = vadd.f32 %v3430_v17, %v3428_v62  ;;  %v2458_v19 = vld [vmem:[%s2668_s23 + $0x160] sm:$0xff] }
 0x230   : > { %v2400_v5 = vpop.eup %2399  ;;  %v1668_v10 = vadd.f32 %v1652_v61, %v1636_v3  ;;  %v1769_v9 = vsel %vm1757_vm5, %v1620_v43, %v1752_v18 }
 0x231   : > { %v3443_v23 = vpop.eup %2401  ;;  %1786 = vst.msk [vmem:[%s3106_s30 + $0x58] sm:$0xff] %vm1774_vm2, %v1769_v9  ;;  %v1587_v25 = vmul.f32 %v2400_v5, %v3376_v29  ;;  %v1603_v45 = vmul.f32 %v2400_v5, %v3383_v56  ;;  %v1619_v27 = vmul.f32 %v2400_v5, %v3391_v51  ;;  %v2459_v5 = vld [vmem:[%s2668_s23 + $0x78] sm:$0xff] }
 0x232   : > { %v3450_v32 = vpop.eup %2403  ;;  %v1700_v28 = vadd.f32 %v1684_v24, %v1668_v10  ;;  %v1560_v33 = vadd.f32 %v3443_v23, %v1544_v58 }
 0x233   : > { %v3453_v59 = vpop.eup %2405  ;;  %v1635_v46 = vmul.f32 %v2450_v34, %v1587_v25  ;;  %v1651_v48 = vmul.f32 %v2451_v22, %v1603_v45  ;;  %v1734_v29 = vsel %vm1723_vm3, %v1587_v25, 0.0  ;;  %v1683_v15 = vmul.f32 %v2452_v4, %v1619_v27  ;;  %v2462_v22 = vld [vmem:[%s2668_s23 + $0x70] sm:$0xff] }
 0x234   : > { %1716 = vst.msk [vmem:[%s3133_s8 + $0x58] sm:$0xff] %vm498_vm0, %v1700_v28  ;;  %v1751_v56 = vsel %vm1740_vm4, %v1603_v45, %v1734_v29  ;;  %2413 = vrcp.f32 %v1560_v33  ;;  %v1543_v36 = vadd.f32 %v3453_v59, %v3450_v32  ;;  %v2408_v51 = vpop.eup %2407  ;;  %v2461_v45 = vld [vmem:[%s2668_s23 + $0x178] sm:$0xff]  ;;  %v2463_v29 = vld [vmem:[%s2668_s23 + $0xf0] sm:$0xff] }
 0x235   : > { %v1667_v63 = vadd.f32 %v1651_v48, %v1635_v46  ;;  %v1768_v41 = vsel %vm1757_vm5, %v1619_v27, %v1751_v56  ;;  %v2464_v4 = vld [vmem:[%s2668_s23 + $0x170] sm:$0xff] }
 0x236   : > { %v2410_v60 = vpop.eup %2409  ;;  %1785 = vst.msk [vmem:[%s3106_s30 + $0x50] sm:$0xff] %vm1774_vm2, %v1768_v41  ;;  %v1559_v20 = vadd.f32 %v2408_v51, %v1543_v36 }
 0x237   : > { %v1699_v38 = vadd.f32 %v1683_v15, %v1667_v63  ;;  %v1590_v0 = vmul.f32 %v2410_v60, %v3397_v49  ;;  %v1606_v13 = vmul.f32 %v2410_v60, %v3406_v39  ;;  %v1622_v55 = vmul.f32 %v2410_v60, %v3410_v7 }
 0x238   : > { %2415 = vrcp.f32 %v1559_v20 }
 0x239   : > { %v2412_v1 = vpop.eup %2411  ;;  %1715 = vst.msk [vmem:[%s3133_s8 + $0x50] sm:$0xff] %vm498_vm0, %v1699_v38  ;;  %v1638_v37 = vmul.f32 %v2453_v16, %v1590_v0  ;;  %v1654_v50 = vmul.f32 %v2454_v54, %v1606_v13  ;;  %v1737_v21 = vsel %vm1723_vm3, %v1590_v0, 0.0  ;;  %v1686_v2 = vmul.f32 %v2455_v8, %v1622_v55 }
 0x23a   : > { %v1754_v49 = vsel %vm1740_vm4, %v1606_v13, %v1737_v21  ;;  %v1589_v39 = vmul.f32 %v2412_v1, %v3416_v44  ;;  %v1605_v40 = vmul.f32 %v2412_v1, %v3418_v42  ;;  %v1621_v57 = vmul.f32 %v2412_v1, %v2394_v35 }
 0x23b   : > { %v1670_v7 = vadd.f32 %v1654_v50, %v1638_v37  ;;  %v1771_v11 = vsel %vm1757_vm5, %v1622_v55, %v1754_v49 }
 0x23c   : > { %1788 = vst.msk [vmem:[%s3106_s30 + $0x68] sm:$0xff] %vm1774_vm2, %v1771_v11  ;;  %v1637_v30 = vmul.f32 %v2456_v12, %v1589_v39  ;;  %v1653_v52 = vmul.f32 %v2457_v6, %v1605_v40  ;;  %v1736_v44 = vsel %vm1723_vm3, %v1589_v39, 0.0  ;;  %v1685_v3 = vmul.f32 %v2458_v19, %v1621_v57 }
 0x23d   : > { %v1702_v42 = vadd.f32 %v1686_v2, %v1670_v7  ;;  %v1753_v35 = vsel %vm1740_vm4, %v1605_v40, %v1736_v44 }
 0x23e   : > { %v2414_v43 = vpop.eup %2413  ;;  %v1669_v47 = vadd.f32 %v1653_v52, %v1637_v30  ;;  %v1770_v26 = vsel %vm1757_vm5, %v1621_v57, %v1753_v35 }
 0x23f   : > { %1718 = vst.msk [vmem:[%s3133_s8 + $0x68] sm:$0xff] %vm498_vm0, %v1702_v42  ;;  %v1592_v61 = vmul.f32 %v2414_v43, %v3428_v62  ;;  %v1608_v31 = vmul.f32 %v2414_v43, %v3430_v17  ;;  %v1624_v18 = vmul.f32 %v2414_v43, %v3443_v23 }
 0x240   : > { %1787 = vst.msk [vmem:[%s3106_s30 + $0x60] sm:$0xff] %vm1774_vm2, %v1770_v26  ;;  %v1701_v58 = vadd.f32 %v1685_v3, %v1669_v47 }
 0x241   : > { %v1640_v10 = vmul.f32 %v2459_v5, %v1592_v61  ;;  %v1656_v24 = vmul.f32 %v2460_v53, %v1608_v31  ;;  %v1739_v9 = vsel %vm1723_vm3, %v1592_v61, 0.0  ;;  %v1688_v62 = vmul.f32 %v2461_v45, %v1624_v18 }
 0x242   : > { %v2416_v25 = vpop.eup %2415  ;;  %1717 = vst.msk [vmem:[%s3133_s8 + $0x60] sm:$0xff] %vm498_vm0, %v1701_v58  ;;  %v1756_v17 = vsel %vm1740_vm4, %v1608_v31, %v1739_v9 }
 0x243   : > { %v1672_v23 = vadd.f32 %v1656_v24, %v1640_v10  ;;  %v1773_v27 = vsel %vm1757_vm5, %v1624_v18, %v1756_v17  ;;  %v1591_v28 = vmul.f32 %v2416_v25, %v3450_v32  ;;  %v1607_v33 = vmul.f32 %v2416_v25, %v3453_v59 }
 0x244   : > { %1790 = vst.msk [vmem:[%s3106_s30 + $0x78] sm:$0xff] %vm1774_vm2, %v1773_v27  ;;  %v1623_v34 = vmul.f32 %v2416_v25, %v2408_v51 }
 0x245   : > { %v1704_v46 = vadd.f32 %v1688_v62, %v1672_v23  ;;  %v1639_v48 = vmul.f32 %v2462_v22, %v1591_v28  ;;  %v1655_v56 = vmul.f32 %v2463_v29, %v1607_v33  ;;  %v1738_v36 = vsel %vm1723_vm3, %v1591_v28, 0.0 }
 0x246   : > { %v1755_v63 = vsel %vm1740_vm4, %v1607_v33, %v1738_v36  ;;  %v1687_v59 = vmul.f32 %v2464_v4, %v1623_v34 }
 0x247   : > { %1720 = vst.msk [vmem:[%s3133_s8 + $0x78] sm:$0xff] %vm498_vm0, %v1704_v46  ;;  %v1671_v32 = vadd.f32 %v1655_v56, %v1639_v48  ;;  %v1772_v15 = vsel %vm1757_vm5, %v1623_v34, %v1755_v63 }
 0x248   : > { %1789 = vst.msk [vmem:[%s3106_s30 + $0x70] sm:$0xff] %vm1774_vm2, %v1772_v15 }
 0x249   : > { %v1703_v51 = vadd.f32 %v1687_v59, %v1671_v32 }
 0x24b   : > { %1719 = vst.msk [vmem:[%s3133_s8 + $0x70] sm:$0xff] %vm498_vm0, %v1703_v51 }
 0x24c PF: > { %p13_p9 = scmp.ge.s32.totalorder %s2536_s22, 4   ;;  %s3550_s18 = smov %s2483_s19 }
 0x24d   : > { %s3551_s19 = smov %s2545_s25  ;;  %s3552_s20 = smov %s2536_s22 }
 0x24e   :  { %15 = sbr.rel (!%p13_p9) target bundleno = 2 (0x2), region = 123 }

</bundles_post_ra>
